<compile_context>
chip_gen: v7x
topology: tpu7x:2x2x1
jax: 0.10.0
libtpu: 0.0.40
codegen_flags: <defaults>
</compile_context>

<pallas_src>
import functools

import numpy as np
import jax
import jax.numpy as jnp
from jax.experimental import pallas as pl
from jax.experimental.pallas import tpu as pltpu


# ----------------------------------------------------------------------------
# Fast path: flat SE (all kernel entries non-zero, no structuring element)
# with geodesic border.  Separable, pad-less, accumulates into refs.
#   x_ref : (Nb, H, W) input block      o_ref : (Nb, H, W) output block
#   r_ref : (Nb, H, W) row-pass scratch d_ref : (Nb, H, W) dilation scratch
# `row_shifts` / `col_shifts` are static tuples of (dst_lo, src_lo, n)
# describing every non-center, edge-clipped shift of the structuring element.
# ----------------------------------------------------------------------------
def _closing_flat_kernel(x_ref, o_ref, r_ref, d_ref, *, row_shifts, col_shifts):
    cd = r_ref.dtype

    # -------- stage 1: dilation = separable running max (edge-clipped) ------
    # Row pass: init with the centre shift, then RMW partial row bands.
    r_ref[...] = x_ref[...].astype(cd)
    for dl, sl, n in row_shifts:
        r_ref[:, dl:dl + n, :] = jnp.maximum(
            r_ref[:, dl:dl + n, :], x_ref[:, sl:sl + n, :].astype(cd))
    # Column pass into the dilation scratch.
    d_ref[...] = r_ref[...]
    for dl, sl, n in col_shifts:
        d_ref[:, :, dl:dl + n] = jnp.maximum(
            d_ref[:, :, dl:dl + n], r_ref[:, :, sl:sl + n])

    # -------- stage 2: erosion = separable running min of the dilation ------
    r_ref[...] = d_ref[...]
    for dl, sl, n in row_shifts:
        r_ref[:, dl:dl + n, :] = jnp.minimum(
            r_ref[:, dl:dl + n, :], d_ref[:, sl:sl + n, :])
    o_ref[...] = r_ref[...].astype(o_ref.dtype)
    for dl, sl, n in col_shifts:
        o_ref[:, :, dl:dl + n] = jnp.minimum(
            o_ref[:, :, dl:dl + n], r_ref[:, :, sl:sl + n].astype(o_ref.dtype))


# ----------------------------------------------------------------------------
# General path: non-flat SE / kernels with zero entries / constant border.
# Keeps two padded scratches but never materialises a full padded plane into
# vregs: each shift is a ref-sliced load and the max/min accumulates into the
# output ref (register accumulation only as a non-f32 fallback).
# ----------------------------------------------------------------------------
def _closing_general_kernel(x_ref, o_ref, xpad_ref, dpad_ref, *,
                            se_h, se_w, H, W, oh, ow,
                            nb, nb_flip, dil_border, ero_border):
    Nb = x_ref.shape[0]
    H_pad = H + se_h - 1
    W_pad = W + se_w - 1

    def fill_border(ref, val):
        # Only the O(perimeter) strips; the interior is fully overwritten.
        top, bot = oh, se_h - 1 - oh
        lef, rig = ow, se_w - 1 - ow
        if top:
            ref[:, 0:top, :] = jnp.full((Nb, top, W_pad), val, jnp.float32)
        if bot:
            ref[:, oh + H:H_pad, :] = jnp.full((Nb, bot, W_pad), val,
                                               jnp.float32)
        if lef:
            ref[:, :, 0:lef] = jnp.full((Nb, H_pad, lef), val, jnp.float32)
        if rig:
            ref[:, :, ow + W:W_pad] = jnp.full((Nb, H_pad, rig), val,
                                               jnp.float32)

    # ---------------- stage 1: dilation --------------------------------------
    fill_border(xpad_ref, dil_border)
    # TODO(synk): overlap this interior copy with the border fill via a local
    # DMA (pltpu.sync_copy) when dtypes match, to free vst slots.
    xpad_ref[:, oh:oh + H, ow:ow + W] = x_ref[...].astype(jnp.float32)

    use_out_acc = (o_ref.dtype == jnp.float32)   # accumulate in o_ref (aligned)
    dil = None
    first = True
    for p in range(se_h):
        for q in range(se_w):
            win = xpad_ref[:, p:p + H, q:q + W]      # ref-sliced load per shift
            c = float(nb_flip[p][q])
            v = win if c == 0.0 else win + c         # skip zero adds
            if use_out_acc:
                o_ref[...] = v if first else jnp.maximum(o_ref[...], v)
            else:
                dil = v if dil is None else jnp.maximum(dil, v)
            first = False

    # ---------------- stage 2: erosion of the dilation -----------------------
    fill_border(dpad_ref, ero_border)
    if use_out_acc:
        dpad_ref[:, oh:oh + H, ow:ow + W] = o_ref[...]
    else:
        dpad_ref[:, oh:oh + H, ow:ow + W] = dil

    first = True
    for p in range(se_h):
        for q in range(se_w):
            win = dpad_ref[:, p:p + H, q:q + W]
            c = float(nb[p][q])
            v = (win if c == 0.0 else win - c).astype(o_ref.dtype)
            o_ref[...] = v if first else jnp.minimum(o_ref[...], v)
            first = False


# ----------------------------------------------------------------------------
# Sizing helpers.
# ----------------------------------------------------------------------------
def _edge_shifts(se, o, L):
    """Non-center SE shifts d=p-o as (dst_lo, src_lo, n), clipped to [0, L)."""
    res = []
    for p in range(se):
        d = p - o
        if d == 0:
            continue
        n = L - abs(d)
        if n <= 0:
            continue          # window position entirely outside the image
        res.append((max(0, -d), max(0, d), n))
    return tuple(res)


def _plane_vmem_bytes(h, w, dtype):
    """VMEM bytes of one (h, w) plane after dtype-aware (8k, 128) tiling."""
    itemsize = np.dtype(dtype).itemsize
    sub = 8 * max(1, 4 // itemsize)          # bf16 -> 16 sublanes, int8 -> 32
    hp = -(-h // sub) * sub
    wp = -(-w // 128) * 128
    return hp * wp * itemsize


def _vmem_budget_and_limit():
    """(block budget, vmem_limit_bytes) derived from the chip's VMEM size."""
    cap = None
    try:
        cap = int(getattr(pltpu.get_tpu_info(), "vmem_capacity_bytes", 0)) or None
    except Exception:
        cap = None
    if cap is None:
        cap = 64 * 1024 * 1024              # conservative (v7x has the least)
    limit = min(int(cap * 0.75), 100 * 1024 * 1024)
    limit = max(limit, 32 * 1024 * 1024)
    budget = int(limit * 0.6)               # headroom for compiler scratch
    return budget, limit


def _is_dual_tensorcore_chip():
    """v7x-class chips shard the 'parallel' grid axis across 2 TensorCores."""
    try:
        kind = jax.devices()[0].device_kind.lower()
    except Exception:
        return False
    return "7" in kind


def _choose_nb(N, per_plane_bytes, budget_bytes, prefer_even_grid):
    """Planes per grid step.  Returns 0 when even one plane does not fit."""
    nb_fit = int(budget_bytes // max(per_plane_bytes, 1))
    if nb_fit < 1:
        return 0
    nb = min(N, nb_fit)
    if prefer_even_grid and N >= 2:
        g = -(-N // nb)
        if g < 2:
            g = 2
        elif g % 2:
            g += 1
        nb = max(1, -(-N // g))
    return nb


# ----------------------------------------------------------------------------
# Pure-JAX reference (mirrors the torch unfold path).  Also used as fallback
# when a single plane + scratches exceeds the VMEM budget.
# ----------------------------------------------------------------------------
def _closing_jax(image, kernel_np, structuring_element=None, origin=None,
                 border_type='geodesic', border_value=0.0, max_val=10000.0):
    kernel_np = np.asarray(kernel_np)
    se_h, se_w = kernel_np.shape
    if origin is None:
        origin = [se_h // 2, se_w // 2]
    oh, ow = int(origin[0]), int(origin[1])
    if structuring_element is None:
        nb = np.zeros(kernel_np.shape, dtype=np.float64)
    else:
        nb = np.asarray(structuring_element, dtype=np.float64).copy()
    nb[kernel_np == 0] = -float(max_val)

    def _morph(img, is_dil):
        B, C, H, W = img.shape
        if border_type == 'geodesic':
            padv = -max_val if is_dil else max_val
        else:
            padv = border_value
        xp = jnp.pad(img.astype(jnp.float32),
                     ((0, 0), (0, 0), (oh, se_h - oh - 1), (ow, se_w - ow - 1)),
                     constant_values=padv)
        nb_use = nb[::-1, ::-1] if is_dil else nb
        acc = None
        for p in range(se_h):
            for q in range(se_w):
                win = xp[:, :, p:p + H, q:q + W]
                v = win + nb_use[p, q] if is_dil else win - nb_use[p, q]
                acc = v if acc is None else (jnp.maximum(acc, v) if is_dil
                                             else jnp.minimum(acc, v))
        return acc

    return _morph(_morph(image, True), False).astype(image.dtype)


# ----------------------------------------------------------------------------
# Wrapper.
# ----------------------------------------------------------------------------
def closing_pallas(image, kernel_np, structuring_element=None, origin=None,
                   border_type='geodesic', border_value=0.0, max_val=10000.0):
    """image: (B, C, H, W) jax array -> closed image, same shape/dtype."""
    kernel_np = np.asarray(kernel_np)
    assert kernel_np.ndim == 2
    se_h, se_w = kernel_np.shape
    if origin is None:
        origin = [se_h // 2, se_w // 2]
    oh, ow = int(origin[0]), int(origin[1])
    assert 0 <= oh < se_h and 0 <= ow < se_w

    if border_type == 'geodesic':
        dil_border = -float(max_val)
        ero_border = float(max_val)
    elif border_type == 'constant':
        dil_border = float(border_value)
        ero_border = float(border_value)
    else:
        # TODO(synk): reflect/replicate border modes are not implemented.
        raise NotImplementedError(f"border_type {border_type!r} not supported")

    # Neighborhood values exactly as in the torch reference.
    if structuring_element is None:
        nb = np.zeros(kernel_np.shape, dtype=np.float64)
    else:
        nb = np.asarray(structuring_element, dtype=np.float64).copy()
    nb[kernel_np == 0] = -float(max_val)
    flat = (structuring_element is None) and bool(np.all(kernel_np != 0))
    use_fast = flat and (border_type == 'geodesic')

    B, C, H, W = image.shape
    N = B * C
    # NOTE: feed lane-dense images (W a multiple of 128) when possible; with
    # small W every store is a masked vst and the 128-lane round-up is wasted.
    x = image.reshape(N, H, W)

    budget, vmem_limit = _vmem_budget_and_limit()
    prefer_even = _is_dual_tensorcore_chip()

    if use_fast:
        cd = (image.dtype
              if np.dtype(image.dtype).name in ("float32", "bfloat16")
              else jnp.float32)
        per_plane = (2 * _plane_vmem_bytes(H, W, image.dtype)   # input (2-buf)
                     + 2 * _plane_vmem_bytes(H, W, image.dtype)  # output (2-buf)
                     + 2 * _plane_vmem_bytes(H, W, cd))          # two scratches
    else:
        H_pad = H + se_h - 1
        W_pad = W + se_w - 1
        per_plane = (2 * _plane_vmem_bytes(H, W, image.dtype)
                     + 2 * _plane_vmem_bytes(H, W, image.dtype)
                     + _plane_vmem_bytes(H_pad, W_pad, jnp.float32)
                     + _plane_vmem_bytes(H_pad, W_pad, jnp.float32))

    Nb = _choose_nb(N, per_plane, budget, prefer_even)
    if Nb == 0:
        # TODO(synk): add halo'd H-band spatial tiling for planes that do not
        # fit in VMEM; for now fall back to a pure-JAX implementation.
        return _closing_jax(image, kernel_np, structuring_element, origin,
                            border_type, border_value, max_val)

    grid = (int(pl.cdiv(N, Nb)),)

    if use_fast:
        # TODO(synk): for very large flat SEs a log-step (doubling) running
        # max/min would cut the per-axis op count from se-1 to ~log2(se).
        kern = functools.partial(
            _closing_flat_kernel,
            row_shifts=_edge_shifts(se_h, oh, H),
            col_shifts=_edge_shifts(se_w, ow, W))
        scratches = [pltpu.VMEM((Nb, H, W), cd),
                     pltpu.VMEM((Nb, H, W), cd)]
    else:
        kern = functools.partial(
            _closing_general_kernel,
            se_h=se_h, se_w=se_w, H=H, W=W, oh=oh, ow=ow,
            nb=tuple(map(tuple, nb.tolist())),
            nb_flip=tuple(map(tuple, nb[::-1, ::-1].tolist())),
            dil_border=dil_border, ero_border=ero_border)
        scratches = [pltpu.VMEM((Nb, H_pad, W_pad), jnp.float32),
                     pltpu.VMEM((Nb, H_pad, W_pad), jnp.float32)]

    out = pl.pallas_call(
        kern,
        out_shape=jax.ShapeDtypeStruct((N, H, W), image.dtype),
        grid_spec=pltpu.PrefetchScalarGridSpec(
            num_scalar_prefetch=0,
            grid=grid,
            in_specs=[pl.BlockSpec((Nb, H, W), lambda i: (i, 0, 0))],
            out_specs=pl.BlockSpec((Nb, H, W), lambda i: (i, 0, 0)),
            scratch_shapes=scratches,
        ),
        compiler_params=pltpu.CompilerParams(
            dimension_semantics=("parallel",),
            vmem_limit_bytes=vmem_limit,
        ),
    )(x)
    return out.reshape(B, C, H, W)


class ClosingPallas:
    """JAX/Pallas equivalent of torchkit Closing (unfold engine)."""

    def __init__(self, kernel, structuring_element=None, origin=None,
                 border_type='geodesic', border_value=0.0, max_val=10000.0,
                 engine='unfold'):
        self.kernel = np.asarray(kernel, dtype=np.float32)
        self.structuring_element = (None if structuring_element is None
                                    else np.asarray(structuring_element,
                                                    dtype=np.float32))
        self.origin = origin
        self.border_type = border_type
        self.border_value = border_value
        self.max_val = float(max_val)
        self.engine = engine  # both torch engines produce identical values

    def __call__(self, image):
        return closing_pallas(image, self.kernel, self.structuring_element,
                              self.origin, self.border_type,
                              self.border_value, self.max_val)


if __name__ == "__main__":
    key = jax.random.PRNGKey(0)
    B, C, H, W = 2, 4, 16, 16
    image = jax.random.uniform(key, (B, C, H, W), dtype=jnp.float32)

    # 1) Flat 3x3 SE (module defaults) -> separable pad-less fast path.
    se_flat = np.ones((3, 3), dtype=np.float32)
    out_flat = jax.block_until_ready(ClosingPallas(se_flat)(image))
    ref_flat = jax.block_until_ready(_closing_jax(image, se_flat))
    assert out_flat.shape == (B, C, H, W) and out_flat.dtype == jnp.float32
    np.testing.assert_allclose(np.asarray(out_flat), np.asarray(ref_flat),
                               rtol=1e-6, atol=1e-6)

    # 2) Cross-shaped SE -> general (padded) path.
    se_cross = np.array([[0, 1, 0], [1, 1, 1], [0, 1, 0]], dtype=np.float32)
    out_cross = jax.block_until_ready(ClosingPallas(se_cross)(image))
    ref_cross = jax.block_until_ready(_closing_jax(image, se_cross))
    np.testing.assert_allclose(np.asarray(out_cross), np.asarray(ref_cross),
                               rtol=1e-6, atol=1e-6)

    print("KERNEL_OK")
</pallas_src>

<mosaic_0001>
module attributes {stable_mosaic.version = 11 : i64} {
  func.func @_closing_flat_kernel(%arg0: i32, %arg1: memref<8x16x16xf32, #tpu.memory_space<vmem>>, %arg2: memref<8x16x16xf32, #tpu.memory_space<vmem>>, %arg3: memref<8x16x16xf32, #tpu.memory_space<vmem>>, %arg4: memref<8x16x16xf32, #tpu.memory_space<vmem>>) attributes {dimension_semantics = [#tpu.dimension_semantics<parallel>], iteration_bounds = array<i64: 1>, scalar_prefetch = 0 : i64, scratch_operands = 2 : i64, tpu.core_type = #tpu.core_type<tc>, window_params = [{transform_indices = @transform_0, window_bounds = array<i64: 8, 16, 16>}, {transform_indices = @transform_1, window_bounds = array<i64: 8, 16, 16>}]} {
    %c0 = arith.constant 0 : index
    %c0_0 = arith.constant 0 : index
    %c0_1 = arith.constant 0 : index
    %0 = vector.load %arg1[%c0, %c0_0, %c0_1] : memref<8x16x16xf32, #tpu.memory_space<vmem>>, vector<8x16x16xf32>
    %c0_2 = arith.constant 0 : index
    %c0_3 = arith.constant 0 : index
    %c0_4 = arith.constant 0 : index
    %1 = vector.load %arg3[%c0_2, %c0_3, %c0_4] : memref<8x16x16xf32, #tpu.memory_space<vmem>>, vector<8x16x16xf32>
    tpu.vector_store %arg3[%c0_2, %c0_3, %c0_4], %0 {strides = array<i32>} : memref<8x16x16xf32, #tpu.memory_space<vmem>>, vector<8x16x16xf32>,
    %c0_5 = arith.constant 0 : index
    %c1 = arith.constant 1 : index
    %c0_6 = arith.constant 0 : index
    %2 = vector.load %arg3[%c0_5, %c1, %c0_6] : memref<8x16x16xf32, #tpu.memory_space<vmem>>, vector<8x15x16xf32>
    %c0_7 = arith.constant 0 : index
    %c0_8 = arith.constant 0 : index
    %c0_9 = arith.constant 0 : index
    %3 = vector.load %arg1[%c0_7, %c0_8, %c0_9] : memref<8x16x16xf32, #tpu.memory_space<vmem>>, vector<8x15x16xf32>
    %4 = arith.maximumf %2, %3 : vector<8x15x16xf32>
    %c0_10 = arith.constant 0 : index
    %c1_11 = arith.constant 1 : index
    %c0_12 = arith.constant 0 : index
    %5 = vector.load %arg3[%c0_10, %c1_11, %c0_12] : memref<8x16x16xf32, #tpu.memory_space<vmem>>, vector<8x15x16xf32>
    tpu.vector_store %arg3[%c0_10, %c1_11, %c0_12], %4 {strides = array<i32>} : memref<8x16x16xf32, #tpu.memory_space<vmem>>, vector<8x15x16xf32>,
    %c0_13 = arith.constant 0 : index
    %c0_14 = arith.constant 0 : index
    %c0_15 = arith.constant 0 : index
    %6 = vector.load %arg3[%c0_13, %c0_14, %c0_15] : memref<8x16x16xf32, #tpu.memory_space<vmem>>, vector<8x15x16xf32>
    %c0_16 = arith.constant 0 : index
    %c1_17 = arith.constant 1 : index
    %c0_18 = arith.constant 0 : index
    %7 = vector.load %arg1[%c0_16, %c1_17, %c0_18] : memref<8x16x16xf32, #tpu.memory_space<vmem>>, vector<8x15x16xf32>
    %8 = arith.maximumf %6, %7 : vector<8x15x16xf32>
    %c0_19 = arith.constant 0 : index
    %c0_20 = arith.constant 0 : index
    %c0_21 = arith.constant 0 : index
    %9 = vector.load %arg3[%c0_19, %c0_20, %c0_21] : memref<8x16x16xf32, #tpu.memory_space<vmem>>, vector<8x15x16xf32>
    tpu.vector_store %arg3[%c0_19, %c0_20, %c0_21], %8 {strides = array<i32>} : memref<8x16x16xf32, #tpu.memory_space<vmem>>, vector<8x15x16xf32>,
    %c0_22 = arith.constant 0 : index
    %c0_23 = arith.constant 0 : index
    %c0_24 = arith.constant 0 : index
    %10 = vector.load %arg3[%c0_22, %c0_23, %c0_24] : memref<8x16x16xf32, #tpu.memory_space<vmem>>, vector<8x16x16xf32>
    %c0_25 = arith.constant 0 : index
    %c0_26 = arith.constant 0 : index
    %c0_27 = arith.constant 0 : index
    %11 = vector.load %arg4[%c0_25, %c0_26, %c0_27] : memref<8x16x16xf32, #tpu.memory_space<vmem>>, vector<8x16x16xf32>
    tpu.vector_store %arg4[%c0_25, %c0_26, %c0_27], %10 {strides = array<i32>} : memref<8x16x16xf32, #tpu.memory_space<vmem>>, vector<8x16x16xf32>,
    %c0_28 = arith.constant 0 : index
    %c0_29 = arith.constant 0 : index
    %c1_30 = arith.constant 1 : index
    %12 = vector.load %arg4[%c0_28, %c0_29, %c1_30] : memref<8x16x16xf32, #tpu.memory_space<vmem>>, vector<8x16x15xf32>
    %c0_31 = arith.constant 0 : index
    %c0_32 = arith.constant 0 : index
    %c0_33 = arith.constant 0 : index
    %13 = vector.load %arg3[%c0_31, %c0_32, %c0_33] : memref<8x16x16xf32, #tpu.memory_space<vmem>>, vector<8x16x15xf32>
    %14 = arith.maximumf %12, %13 : vector<8x16x15xf32>
    %c0_34 = arith.constant 0 : index
    %c0_35 = arith.constant 0 : index
    %c1_36 = arith.constant 1 : index
    %15 = vector.load %arg4[%c0_34, %c0_35, %c1_36] : memref<8x16x16xf32, #tpu.memory_space<vmem>>, vector<8x16x15xf32>
    tpu.vector_store %arg4[%c0_34, %c0_35, %c1_36], %14 {strides = array<i32>} : memref<8x16x16xf32, #tpu.memory_space<vmem>>, vector<8x16x15xf32>,
    %c0_37 = arith.constant 0 : index
    %c0_38 = arith.constant 0 : index
    %c0_39 = arith.constant 0 : index
    %16 = vector.load %arg4[%c0_37, %c0_38, %c0_39] : memref<8x16x16xf32, #tpu.memory_space<vmem>>, vector<8x16x15xf32>
    %c0_40 = arith.constant 0 : index
    %c0_41 = arith.constant 0 : index
    %c1_42 = arith.constant 1 : index
    %17 = vector.load %arg3[%c0_40, %c0_41, %c1_42] : memref<8x16x16xf32, #tpu.memory_space<vmem>>, vector<8x16x15xf32>
    %18 = arith.maximumf %16, %17 : vector<8x16x15xf32>
    %c0_43 = arith.constant 0 : index
    %c0_44 = arith.constant 0 : index
    %c0_45 = arith.constant 0 : index
    %19 = vector.load %arg4[%c0_43, %c0_44, %c0_45] : memref<8x16x16xf32, #tpu.memory_space<vmem>>, vector<8x16x15xf32>
    tpu.vector_store %arg4[%c0_43, %c0_44, %c0_45], %18 {strides = array<i32>} : memref<8x16x16xf32, #tpu.memory_space<vmem>>, vector<8x16x15xf32>,
    %c0_46 = arith.constant 0 : index
    %c0_47 = arith.constant 0 : index
    %c0_48 = arith.constant 0 : index
    %20 = vector.load %arg4[%c0_46, %c0_47, %c0_48] : memref<8x16x16xf32, #tpu.memory_space<vmem>>, vector<8x16x16xf32>
    %c0_49 = arith.constant 0 : index
    %c0_50 = arith.constant 0 : index
    %c0_51 = arith.constant 0 : index
    %21 = vector.load %arg3[%c0_49, %c0_50, %c0_51] : memref<8x16x16xf32, #tpu.memory_space<vmem>>, vector<8x16x16xf32>
    tpu.vector_store %arg3[%c0_49, %c0_50, %c0_51], %20 {strides = array<i32>} : memref<8x16x16xf32, #tpu.memory_space<vmem>>, vector<8x16x16xf32>,
    %c0_52 = arith.constant 0 : index
    %c1_53 = arith.constant 1 : index
    %c0_54 = arith.constant 0 : index
    %22 = vector.load %arg3[%c0_52, %c1_53, %c0_54] : memref<8x16x16xf32, #tpu.memory_space<vmem>>, vector<8x15x16xf32>
    %c0_55 = arith.constant 0 : index
    %c0_56 = arith.constant 0 : index
    %c0_57 = arith.constant 0 : index
    %23 = vector.load %arg4[%c0_55, %c0_56, %c0_57] : memref<8x16x16xf32, #tpu.memory_space<vmem>>, vector<8x15x16xf32>
    %24 = arith.minimumf %22, %23 : vector<8x15x16xf32>
    %c0_58 = arith.constant 0 : index
    %c1_59 = arith.constant 1 : index
    %c0_60 = arith.constant 0 : index
    %25 = vector.load %arg3[%c0_58, %c1_59, %c0_60] : memref<8x16x16xf32, #tpu.memory_space<vmem>>, vector<8x15x16xf32>
    tpu.vector_store %arg3[%c0_58, %c1_59, %c0_60], %24 {strides = array<i32>} : memref<8x16x16xf32, #tpu.memory_space<vmem>>, vector<8x15x16xf32>,
    %c0_61 = arith.constant 0 : index
    %c0_62 = arith.constant 0 : index
    %c0_63 = arith.constant 0 : index
    %26 = vector.load %arg3[%c0_61, %c0_62, %c0_63] : memref<8x16x16xf32, #tpu.memory_space<vmem>>, vector<8x15x16xf32>
    %c0_64 = arith.constant 0 : index
    %c1_65 = arith.constant 1 : index
    %c0_66 = arith.constant 0 : index
    %27 = vector.load %arg4[%c0_64, %c1_65, %c0_66] : memref<8x16x16xf32, #tpu.memory_space<vmem>>, vector<8x15x16xf32>
    %28 = arith.minimumf %26, %27 : vector<8x15x16xf32>
    %c0_67 = arith.constant 0 : index
    %c0_68 = arith.constant 0 : index
    %c0_69 = arith.constant 0 : index
    %29 = vector.load %arg3[%c0_67, %c0_68, %c0_69] : memref<8x16x16xf32, #tpu.memory_space<vmem>>, vector<8x15x16xf32>
    tpu.vector_store %arg3[%c0_67, %c0_68, %c0_69], %28 {strides = array<i32>} : memref<8x16x16xf32, #tpu.memory_space<vmem>>, vector<8x15x16xf32>,
    %c0_70 = arith.constant 0 : index
    %c0_71 = arith.constant 0 : index
    %c0_72 = arith.constant 0 : index
    %30 = vector.load %arg3[%c0_70, %c0_71, %c0_72] : memref<8x16x16xf32, #tpu.memory_space<vmem>>, vector<8x16x16xf32>
    %c0_73 = arith.constant 0 : index
    %c0_74 = arith.constant 0 : index
    %c0_75 = arith.constant 0 : index
    %31 = vector.load %arg2[%c0_73, %c0_74, %c0_75] : memref<8x16x16xf32, #tpu.memory_space<vmem>>, vector<8x16x16xf32>
    tpu.vector_store %arg2[%c0_73, %c0_74, %c0_75], %30 {strides = array<i32>} : memref<8x16x16xf32, #tpu.memory_space<vmem>>, vector<8x16x16xf32>,
    %c0_76 = arith.constant 0 : index
    %c0_77 = arith.constant 0 : index
    %c1_78 = arith.constant 1 : index
    %32 = vector.load %arg2[%c0_76, %c0_77, %c1_78] : memref<8x16x16xf32, #tpu.memory_space<vmem>>, vector<8x16x15xf32>
    %c0_79 = arith.constant 0 : index
    %c0_80 = arith.constant 0 : index
    %c0_81 = arith.constant 0 : index
    %33 = vector.load %arg3[%c0_79, %c0_80, %c0_81] : memref<8x16x16xf32, #tpu.memory_space<vmem>>, vector<8x16x15xf32>
    %34 = arith.minimumf %32, %33 : vector<8x16x15xf32>
    %c0_82 = arith.constant 0 : index
    %c0_83 = arith.constant 0 : index
    %c1_84 = arith.constant 1 : index
    %35 = vector.load %arg2[%c0_82, %c0_83, %c1_84] : memref<8x16x16xf32, #tpu.memory_space<vmem>>, vector<8x16x15xf32>
    tpu.vector_store %arg2[%c0_82, %c0_83, %c1_84], %34 {strides = array<i32>} : memref<8x16x16xf32, #tpu.memory_space<vmem>>, vector<8x16x15xf32>,
    %c0_85 = arith.constant 0 : index
    %c0_86 = arith.constant 0 : index
    %c0_87 = arith.constant 0 : index
    %36 = vector.load %arg2[%c0_85, %c0_86, %c0_87] : memref<8x16x16xf32, #tpu.memory_space<vmem>>, vector<8x16x15xf32>
    %c0_88 = arith.constant 0 : index
    %c0_89 = arith.constant 0 : index
    %c1_90 = arith.constant 1 : index
    %37 = vector.load %arg3[%c0_88, %c0_89, %c1_90] : memref<8x16x16xf32, #tpu.memory_space<vmem>>, vector<8x16x15xf32>
    %38 = arith.minimumf %36, %37 : vector<8x16x15xf32>
    %c0_91 = arith.constant 0 : index
    %c0_92 = arith.constant 0 : index
    %c0_93 = arith.constant 0 : index
    %39 = vector.load %arg2[%c0_91, %c0_92, %c0_93] : memref<8x16x16xf32, #tpu.memory_space<vmem>>, vector<8x16x15xf32>
    tpu.vector_store %arg2[%c0_91, %c0_92, %c0_93], %38 {strides = array<i32>} : memref<8x16x16xf32, #tpu.memory_space<vmem>>, vector<8x16x15xf32>,
    return
  }
  func.func @transform_0(%arg0: i32) -> (i32, i32, i32) {
    %c0_i32 = arith.constant 0 : i32
    %c0_i32_0 = arith.constant 0 : i32
    %c0_i32_1 = arith.constant 0 : i32
    return %arg0, %c0_i32, %c0_i32_0 : i32, i32, i32
  }
  func.func @transform_1(%arg0: i32) -> (i32, i32, i32) {
    %c0_i32 = arith.constant 0 : i32
    %c0_i32_0 = arith.constant 0 : i32
    %c0_i32_1 = arith.constant 0 : i32
    return %arg0, %c0_i32, %c0_i32_0 : i32, i32, i32
  }
}

</mosaic_0001>

<bundles_post_ra>
// kernel: tpu_custom_call.1
= control target key start
LH: loop header
LB: loop body
LE: loop exit
PB: predicated region body
PF: predicated region fallthrough
CT: control target
= control target key end

     0   :  { %6 = vsyncpa [#allocation5], 0  ;;  %s1353_s0 = inlined_call_operand.hbm [shape: f32[8,16,16], index: 0, kind: input, shape index: {}]   ;;  %s1354_s1 = inlined_call_operand.hbm [shape: f32[8,16,16], index: 1, kind: output, shape index: {}]  }
   0x1   :  { %7 = vsyncpa [#allocation6], 0  ;;  %s994_s6 = smov [#allocation4]   ;;  %s946_s10 = scalar_lea.hbm %s1353_s0, 2048 }
   0x2   :  { %s13_s7 = sshll.u32 %s994_s6, 4  ;;  %p947_p0 = scmp.ne.s32.totalorder %s1353_s0, %s946_s10  ;;  %s14_s7 = int_to_ptr.vmem [resolvable:$true] %s13_s7 }
   0x3   :  { %p950_p1 = scmp.lt.u32.totalorder %s946_s10, %s1353_s0 }
   0x5   :  { %p952_p2 = pnand %p950_p1, %p947_p0 }
   0x7   :  { %955 = shalt.err (!%p952_p2)
}
   0x8   :  { %s956_s15 = scalar_lea.vmem %s14_s7, 2048  ;;  %p961_p4 = scmp.lt.s32.totalorder %s14_s7, %s14_s7 }
   0x9   :  { %p957_p3 = scmp.ne.s32.totalorder %s14_s7, %s956_s15  ;;  %p962_p5 = scmp.lt.s32.totalorder %s956_s15, %s956_s15 }
   0xb   :  { %p963_p6 = por %p962_p5, %p961_p4 }
   0xd   :  { %p964_p7 = pnand %p963_p6, %p957_p3 }
   0xf   :  { %967 = shalt.err (!%p964_p7)
}
  0x10   :  { %s995_s16 = smov 128   ;;  %s996_s17 = smov 8  }
  0x11   :  { %19 = dma.hbm_to_vmem [thread:$0]  %s1353_s0, 2048, %s14_s7, [#allocation5], %s995_s16, %s995_s16, %s996_s17  }
  0x12   :  { %990 = dma.done.wait [#allocation5], 2048  }
  0x13   :  { %991 = vsyncadd [#allocation5], 4294965248  ;;  %vm39_vm0 = vcmask 130048   ;;  %v25_v0 = vld [vmem:[#allocation4 + $0x10] sm:$0xff]  ;;  %v26_v1 = vld [vmem:[#allocation4 + $0x18] sm:$0xff]  ;;  %vm105_vm1 = vcmask 129024  }
  0x14   :  { %42 = vst.msk [vmem:[#allocation2 + $0x10] sm:$0xff] %vm39_vm0, %v25_v0  ;;  %43 = vst.msk [vmem:[#allocation2 + $0x18] sm:$0xff] %vm39_vm0, %v26_v1  ;;  %v23_v2 = vld [vmem:[#allocation4] sm:$0xff]  ;;  %v24_v3 = vld [vmem:[#allocation4 + $0x8] sm:$0xff]  ;;  %s997_s0 = smov 1   ;;  %s998_s20 = smov 127  }
  0x15   :  { %40 = vst.msk [vmem:[#allocation2] sm:$0xff] %vm39_vm0, %v23_v2  ;;  %41 = vst.msk [vmem:[#allocation2 + $0x8] sm:$0xff] %vm39_vm0, %v24_v3  ;;  %v27_v4 = vld [vmem:[#allocation4 + $0x20] sm:$0xff]  ;;  %v28_v5 = vld [vmem:[#allocation4 + $0x28] sm:$0xff]  ;;  %vm329_vm2 = vcmask 130056   ;;  %vm458_vm3 = vcmask 121856  }
  0x16   :  { %44 = vst.msk [vmem:[#allocation2 + $0x20] sm:$0xff] %vm39_vm0, %v27_v4  ;;  %45 = vst.msk [vmem:[#allocation2 + $0x28] sm:$0xff] %vm39_vm0, %v28_v5  ;;  %v29_v6 = vld [vmem:[#allocation4 + $0x30] sm:$0xff]  ;;  %v30_v7 = vld [vmem:[#allocation4 + $0x38] sm:$0xff]  ;;  %s999_s21 = smov [#allocation7]  }
  0x17   :  { %v75_v8 = vld [vmem:[#allocation4 + $0x18] sm:$0x7f]  ;;  %46 = vst.msk [vmem:[#allocation2 + $0x30] sm:$0xff] %vm39_vm0, %v29_v6  ;;  %47 = vst.msk [vmem:[#allocation2 + $0x38] sm:$0xff] %vm39_vm0, %v30_v7  ;;  %v31_v9 = vld [vmem:[#allocation4 + $0x40] sm:$0xff]  ;;  %s928_s22 = sshll.u32 %s999_s21, 4  ;;  %s929_s22 = int_to_ptr.vmem [resolvable:$true] %s928_s22 }
  0x18   :  { %v73_v10 = vld [vmem:[#allocation4 + $0x8] sm:$0x7f]  ;;  %48 = vst.msk [vmem:[#allocation2 + $0x40] sm:$0xff] %vm39_vm0, %v31_v9  ;;  %v1035_v19 = vld [vmem:[#allocation4 + $0x50] sm:$0xff]  ;;  %v34_v22 = vld [vmem:[#allocation4 + $0x58] sm:$0xff]  ;;  %s968_s23 = scalar_lea.vmem %s929_s22, 2048  ;;  %p973_p9 = scmp.lt.s32.totalorder %s929_s22, %s929_s22 }
  0x19   :  { %v32_v11 = vld [vmem:[#allocation4 + $0x48] sm:$0xff]  ;;  %50 = vst.msk [vmem:[#allocation2 + $0x50] sm:$0xff] %vm39_vm0, %v1035_v19  ;;  %v79_v25 = vld [vmem:[#allocation4 + $0x38] sm:$0x7f]  ;;  %51 = vst.msk [vmem:[#allocation2 + $0x58] sm:$0xff] %vm39_vm0, %v34_v22  ;;  %p969_p8 = scmp.ne.s32.totalorder %s929_s22, %s968_s23  ;;  %p974_p10 = scmp.lt.s32.totalorder %s968_s23, %s968_s23 }
  0x1a   :  { %v77_v14 = vld [vmem:[#allocation4 + $0x28] sm:$0x7f]  ;;  %49 = vst.msk [vmem:[#allocation2 + $0x48] sm:$0xff] %vm39_vm0, %v32_v11  ;;  %v1044_v28 = vld [vmem:[#allocation4 + $0x60] sm:$0xff]  ;;  %v1051_v35 = vld [vmem:[#allocation4 + $0x70] sm:$0xff] }
  0x1b   :  { %v58_v12 = vld [vmem:[#allocation2 + $0x11] sm:$0xff]  ;;  %v59_v13 = vld [vmem:[#allocation2 + $0x19] sm:$0x7f]  ;;  %v36_v29 = vld [vmem:[#allocation4 + $0x68] sm:$0xff]  ;;  %52 = vst.msk [vmem:[#allocation2 + $0x60] sm:$0xff] %vm39_vm0, %v1044_v28  ;;  %p975_p11 = por %p974_p10, %p973_p9 }
  0x1c   :  { %v90_v15 = vmax.f32 %v58_v12, %v25_v0  ;;  %v56_v16 = vld [vmem:[#allocation2 + $0x1] sm:$0xff]  ;;  %v91_v17 = vmax.f32 %v59_v13, %v75_v8  ;;  %v57_v18 = vld [vmem:[#allocation2 + $0x9] sm:$0x7f]  ;;  %53 = vst.msk [vmem:[#allocation2 + $0x68] sm:$0xff] %vm39_vm0, %v36_v29  ;;  %v38_v36 = vld [vmem:[#allocation4 + $0x78] sm:$0xff] }
  0x1d   :  { %v88_v20 = vmax.f32 %v56_v16, %v23_v2  ;;  %v89_v21 = vmax.f32 %v57_v18, %v73_v10  ;;  %v60_v23 = vld [vmem:[#allocation2 + $0x21] sm:$0xff]  ;;  %v61_v24 = vld [vmem:[#allocation2 + $0x29] sm:$0x7f]  ;;  %v139_v37 = vld [vmem:[#allocation4 + $0x11] sm:$0xff]  ;;  %54 = vst.msk [vmem:[#allocation2 + $0x70] sm:$0xff] %vm39_vm0, %v1051_v35  ;;  %p976_p12 = pnand %p975_p11, %p969_p8 }
  0x1e   :  { %107 = vst.msk [vmem:[#allocation2 + $0x11] sm:$0xff] %vm39_vm0, %v90_v15  ;;  %v92_v26 = vmax.f32 %v60_v23, %v27_v4  ;;  %v93_v27 = vmax.f32 %v61_v24, %v77_v14  ;;  %v62_v30 = vld [vmem:[#allocation2 + $0x31] sm:$0xff]  ;;  %v63_v31 = vld [vmem:[#allocation2 + $0x39] sm:$0x7f]  ;;  %v81_v32 = vld [vmem:[#allocation4 + $0x48] sm:$0x7f] }
  0x1f   :  { %108 = vst.msk [vmem:[#allocation2 + $0x19] sm:$0x7f] %vm105_vm1, %v91_v17  ;;  %106 = vst.msk [vmem:[#allocation2 + $0x9] sm:$0x7f] %vm105_vm1, %v89_v21  ;;  %v94_v33 = vmax.f32 %v62_v30, %v29_v6  ;;  %v95_v34 = vmax.f32 %v63_v31, %v79_v25  ;;  %v137_v40 = vld [vmem:[#allocation4 + $0x1] sm:$0xff]  ;;  %v143_v3 = vld [vmem:[#allocation4 + $0x31] sm:$0xff] }
  0x20   :  { %104 = vst.msk [vmem:[#allocation2 + $0x1] sm:$0xff] %vm39_vm0, %v88_v20  ;;  %109 = vst.msk [vmem:[#allocation2 + $0x21] sm:$0xff] %vm39_vm0, %v92_v26  ;;  %v140_v41 = vld [vmem:[#allocation4 + $0x19] sm:$0x7f]  ;;  %v138_v42 = vld [vmem:[#allocation4 + $0x9] sm:$0x7f] }
  0x21   :  { %110 = vst.msk [vmem:[#allocation2 + $0x29] sm:$0x7f] %vm105_vm1, %v93_v27  ;;  %v64_v38 = vld [vmem:[#allocation2 + $0x41] sm:$0xff]  ;;  %v65_v39 = vld [vmem:[#allocation2 + $0x49] sm:$0x7f]  ;;  %v66_v51 = vld [vmem:[#allocation2 + $0x51] sm:$0xff] }
  0x22   :  { %55 = vst.msk [vmem:[#allocation2 + $0x78] sm:$0xff] %vm39_vm0, %v38_v36  ;;  %111 = vst.msk [vmem:[#allocation2 + $0x31] sm:$0xff] %vm39_vm0, %v94_v33  ;;  %v96_v43 = vmax.f32 %v64_v38, %v31_v9  ;;  %v97_v44 = vmax.f32 %v65_v39, %v81_v32  ;;  %v142_v45 = vld [vmem:[#allocation4 + $0x29] sm:$0x7f]  ;;  %v141_v46 = vld [vmem:[#allocation4 + $0x21] sm:$0xff]  ;;  %v98_v58 = vmax.f32 %v66_v51, %v1035_v19 }
  0x23   :  { %112 = vst.msk [vmem:[#allocation2 + $0x39] sm:$0x7f] %vm105_vm1, %v95_v34  ;;  %v83_v47 = vld [vmem:[#allocation4 + $0x58] sm:$0x7f]  ;;  %v85_v48 = vld [vmem:[#allocation4 + $0x68] sm:$0x7f] }
  0x24   :  { %113 = vst.msk [vmem:[#allocation2 + $0x41] sm:$0xff] %vm39_vm0, %v96_v43  ;;  %v144_v56 = vld [vmem:[#allocation4 + $0x39] sm:$0x7f]  ;;  %v68_v62 = vld [vmem:[#allocation2 + $0x61] sm:$0xff]  ;;  %v69_v63 = vld [vmem:[#allocation2 + $0x69] sm:$0x7f] }
  0x25   :  { %v123_v49 = vld [vmem:[#allocation2 + $0x10] sm:$0xff]  ;;  %114 = vst.msk [vmem:[#allocation2 + $0x49] sm:$0x7f] %vm105_vm1, %v97_v44  ;;  %v67_v57 = vld [vmem:[#allocation2 + $0x59] sm:$0x7f]  ;;  %v100_v4 = vmax.f32 %v68_v62, %v1044_v28  ;;  %v101_v5 = vmax.f32 %v69_v63, %v85_v48  ;;  %v145_v13 = vld [vmem:[#allocation4 + $0x41] sm:$0xff] }
  0x26   :  { %v124_v50 = vld [vmem:[#allocation2 + $0x18] sm:$0x7f]  ;;  %v155_v52 = vmax.f32 %v123_v49, %v139_v37  ;;  %v99_v61 = vmax.f32 %v67_v57, %v83_v47  ;;  %115 = vst.msk [vmem:[#allocation2 + $0x51] sm:$0xff] %vm39_vm0, %v98_v58  ;;  %v146_v8 = vld [vmem:[#allocation4 + $0x49] sm:$0x7f]  ;;  %v149_v25 = vld [vmem:[#allocation4 + $0x61] sm:$0xff] }
  0x27   :  { %v121_v53 = vld [vmem:[#allocation2] sm:$0xff]  ;;  %v156_v54 = vmax.f32 %v124_v50, %v140_v41  ;;  %v122_v55 = vld [vmem:[#allocation2 + $0x8] sm:$0x7f]  ;;  %v87_v0 = vld [vmem:[#allocation4 + $0x78] sm:$0x7f]  ;;  %117 = vst.msk [vmem:[#allocation2 + $0x61] sm:$0xff] %vm39_vm0, %v100_v4 }
  0x28   :  { %v153_v59 = vmax.f32 %v121_v53, %v137_v40  ;;  %v154_v60 = vmax.f32 %v122_v55, %v138_v42  ;;  %171 = vst.msk [vmem:[#allocation2 + $0x10] sm:$0xff] %vm39_vm0, %v155_v52  ;;  %v126_v1 = vld [vmem:[#allocation2 + $0x28] sm:$0x7f]  ;;  %v125_v2 = vld [vmem:[#allocation2 + $0x20] sm:$0xff]  ;;  %v147_v22 = vld [vmem:[#allocation4 + $0x51] sm:$0xff] }
  0x29   :  { %172 = vst.msk [vmem:[#allocation2 + $0x18] sm:$0x7f] %vm105_vm1, %v156_v54  ;;  %v158_v6 = vmax.f32 %v126_v1, %v142_v45  ;;  %v157_v7 = vmax.f32 %v125_v2, %v141_v46  ;;  %116 = vst.msk [vmem:[#allocation2 + $0x59] sm:$0x7f] %vm105_vm1, %v99_v61  ;;  %v70_v9 = vld [vmem:[#allocation2 + $0x71] sm:$0xff] }
  0x2a   :  { %169 = vst.msk [vmem:[#allocation2] sm:$0xff] %vm39_vm0, %v153_v59  ;;  %v71_v10 = vld [vmem:[#allocation2 + $0x79] sm:$0x7f]  ;;  %v127_v12 = vld [vmem:[#allocation2 + $0x30] sm:$0xff]  ;;  %v102_v14 = vmax.f32 %v70_v9, %v1051_v35  ;;  %v150_v24 = vld [vmem:[#allocation4 + $0x69] sm:$0x7f] }
  0x2b   :  { %170 = vst.msk [vmem:[#allocation2 + $0x8] sm:$0x7f] %vm105_vm1, %v154_v60  ;;  %v128_v11 = vld [vmem:[#allocation2 + $0x38] sm:$0x7f]  ;;  %118 = vst.msk [vmem:[#allocation2 + $0x69] sm:$0x7f] %vm105_vm1, %v101_v5  ;;  %v103_v15 = vmax.f32 %v71_v10, %v87_v0  ;;  %v159_v17 = vmax.f32 %v127_v12, %v143_v3 }
  0x2c   :  { %174 = vst.msk [vmem:[#allocation2 + $0x28] sm:$0x7f] %vm105_vm1, %v158_v6  ;;  %v160_v16 = vmax.f32 %v128_v11, %v144_v56  ;;  %v130_v18 = vld [vmem:[#allocation2 + $0x48] sm:$0x7f]  ;;  %v129_v19 = vld [vmem:[#allocation2 + $0x40] sm:$0xff]  ;;  %v151_v37 = vld [vmem:[#allocation4 + $0x71] sm:$0xff] }
  0x2d   :  { %173 = vst.msk [vmem:[#allocation2 + $0x20] sm:$0xff] %vm39_vm0, %v157_v7  ;;  %119 = vst.msk [vmem:[#allocation2 + $0x71] sm:$0xff] %vm39_vm0, %v102_v14  ;;  %v162_v20 = vmax.f32 %v130_v18, %v146_v8  ;;  %v161_v21 = vmax.f32 %v129_v19, %v145_v13  ;;  %v148_v23 = vld [vmem:[#allocation4 + $0x59] sm:$0x7f]  ;;  %v131_v28 = vld [vmem:[#allocation2 + $0x50] sm:$0xff] }
  0x2e   :  { %120 = vst.msk [vmem:[#allocation2 + $0x79] sm:$0x7f] %vm105_vm1, %v103_v15  ;;  %176 = vst.msk [vmem:[#allocation2 + $0x38] sm:$0x7f] %vm105_vm1, %v160_v16  ;;  %v152_v29 = vld [vmem:[#allocation4 + $0x79] sm:$0x7f]  ;;  %v163_v33 = vmax.f32 %v131_v28, %v147_v22 }
  0x2f   :  { %175 = vst.msk [vmem:[#allocation2 + $0x30] sm:$0xff] %vm39_vm0, %v159_v17  ;;  %v1077_v26 = vld [vmem:[#allocation2 + $0x10] sm:$0xff]  ;;  %177 = vst.msk [vmem:[#allocation2 + $0x40] sm:$0xff] %vm39_vm0, %v161_v21  ;;  %v133_v36 = vld [vmem:[#allocation2 + $0x60] sm:$0xff] }
  0x30   :  { %v1079_v27 = vld [vmem:[#allocation2 + $0x18] sm:$0xff]  ;;  %178 = vst.msk [vmem:[#allocation2 + $0x48] sm:$0x7f] %vm105_vm1, %v162_v20  ;;  %269 = vrot.lane.b32.xlu1 %v1077_v26, %s997_s0  ;;  %v165_v41 = vmax.f32 %v133_v36, %v149_v25 }
  0x31   :  { %v1085_v30 = vld [vmem:[#allocation2] sm:$0xff]  ;;  %v132_v32 = vld [vmem:[#allocation2 + $0x58] sm:$0x7f]  ;;  %203 = vst.msk [vmem:[#allocation3 + $0x10] sm:$0xff] %vm39_vm0, %v1077_v26  ;;  %204 = vst.msk [vmem:[#allocation3 + $0x18] sm:$0xff] %vm39_vm0, %v1079_v27 }
  0x32   :  { %v234_v31 = vld [vmem:[#allocation2 + $0x8] sm:$0xff]  ;;  %265 = vrot.lane.b32.xlu0 %v1085_v30, %s997_s0  ;;  %v164_v34 = vmax.f32 %v132_v32, %v148_v23  ;;  %201 = vst.msk [vmem:[#allocation3] sm:$0xff] %vm39_vm0, %v1085_v30  ;;  %179 = vst.msk [vmem:[#allocation2 + $0x50] sm:$0xff] %vm39_vm0, %v163_v33 }
  0x33   :  { %v134_v35 = vld [vmem:[#allocation2 + $0x68] sm:$0x7f]  ;;  %202 = vst.msk [vmem:[#allocation3 + $0x8] sm:$0xff] %vm39_vm0, %v234_v31  ;;  %181 = vst.msk [vmem:[#allocation2 + $0x60] sm:$0xff] %vm39_vm0, %v165_v41 }
  0x34   :  { %v238_v38 = vld [vmem:[#allocation2 + $0x28] sm:$0xff]  ;;  %v237_v39 = vld [vmem:[#allocation2 + $0x20] sm:$0xff]  ;;  %v166_v40 = vmax.f32 %v134_v35, %v150_v24  ;;  %180 = vst.msk [vmem:[#allocation2 + $0x58] sm:$0x7f] %vm105_vm1, %v164_v34  ;;  %v135_v43 = vld [vmem:[#allocation2 + $0x70] sm:$0xff]  ;;  %271 = vrot.lane.b32.xlu1 %v1079_v27, %s997_s0 }
  0x35   :  { %v136_v42 = vld [vmem:[#allocation2 + $0x78] sm:$0x7f]  ;;  %206 = vst.msk [vmem:[#allocation3 + $0x28] sm:$0xff] %vm39_vm0, %v238_v38  ;;  %205 = vst.msk [vmem:[#allocation3 + $0x20] sm:$0xff] %vm39_vm0, %v237_v39  ;;  %v167_v47 = vmax.f32 %v135_v43, %v151_v37 }
  0x36   :  { %v240_v44 = vld [vmem:[#allocation2 + $0x38] sm:$0xff]  ;;  %v239_v45 = vld [vmem:[#allocation2 + $0x30] sm:$0xff]  ;;  %182 = vst.msk [vmem:[#allocation2 + $0x68] sm:$0x7f] %vm105_vm1, %v166_v40  ;;  %v168_v46 = vmax.f32 %v136_v42, %v152_v29  ;;  %267 = vrot.lane.b32.xlu0 %v234_v31, %s997_s0  ;;  %v241_v49 = vld [vmem:[#allocation2 + $0x40] sm:$0xff] }
  0x37   :  { %208 = vst.msk [vmem:[#allocation3 + $0x38] sm:$0xff] %vm39_vm0, %v240_v44  ;;  %207 = vst.msk [vmem:[#allocation3 + $0x30] sm:$0xff] %vm39_vm0, %v239_v45  ;;  %v242_v48 = vld [vmem:[#allocation2 + $0x48] sm:$0xff] }
  0x38   :  { %184 = vst.msk [vmem:[#allocation2 + $0x78] sm:$0x7f] %vm105_vm1, %v168_v46  ;;  %275 = vrot.lane.b32.xlu1 %v238_v38, %s997_s0  ;;  %v219_v56 = vld [vmem:[#allocation3 + $0x10] sm:$0xff]  ;;  %v220_v62 = vld [vmem:[#allocation3 + $0x18] sm:$0xff] }
  0x39   :  { %183 = vst.msk [vmem:[#allocation2 + $0x70] sm:$0xff] %vm39_vm0, %v167_v47  ;;  %210 = vst.msk [vmem:[#allocation3 + $0x48] sm:$0xff] %vm39_vm0, %v242_v48  ;;  %v243_v50 = vld [vmem:[#allocation2 + $0x50] sm:$0xff]  ;;  %v217_v57 = vld [vmem:[#allocation3] sm:$0xff] }
  0x3a   :  { %209 = vst.msk [vmem:[#allocation3 + $0x40] sm:$0xff] %vm39_vm0, %v241_v49  ;;  %273 = vrot.lane.b32.xlu0 %v237_v39, %s997_s0  ;;  %211 = vst.msk [vmem:[#allocation3 + $0x50] sm:$0xff] %vm39_vm0, %v243_v50  ;;  %v245_v53 = vld [vmem:[#allocation2 + $0x60] sm:$0xff]  ;;  %v218_v63 = vld [vmem:[#allocation3 + $0x8] sm:$0xff] }
  0x3b   :  { %v244_v51 = vld [vmem:[#allocation2 + $0x58] sm:$0xff]  ;;  %213 = vst.msk [vmem:[#allocation3 + $0x60] sm:$0xff] %vm39_vm0, %v245_v53 }
  0x3c   :  { %212 = vst.msk [vmem:[#allocation3 + $0x58] sm:$0xff] %vm39_vm0, %v244_v51  ;;  %279 = vrot.lane.b32.xlu1 %v240_v44, %s997_s0  ;;  %v222_v4 = vld [vmem:[#allocation3 + $0x28] sm:$0xff]  ;;  %v221_v5 = vld [vmem:[#allocation3 + $0x20] sm:$0xff] }
  0x3d   :  { %v246_v52 = vld [vmem:[#allocation2 + $0x68] sm:$0xff] }
  0x3e   :  { %214 = vst.msk [vmem:[#allocation3 + $0x68] sm:$0xff] %vm39_vm0, %v246_v52  ;;  %277 = vrot.lane.b32.xlu0 %v239_v45, %s997_s0  ;;  %v224_v10 = vld [vmem:[#allocation3 + $0x38] sm:$0xff]  ;;  %v223_v11 = vld [vmem:[#allocation3 + $0x30] sm:$0xff] }
  0x3f   :  { %v248_v54 = vld [vmem:[#allocation2 + $0x78] sm:$0xff] }
  0x40   :  { %v247_v55 = vld [vmem:[#allocation2 + $0x70] sm:$0xff]  ;;  %216 = vst.msk [vmem:[#allocation3 + $0x78] sm:$0xff] %vm39_vm0, %v248_v54  ;;  %283 = vrot.lane.b32.xlu1 %v242_v48, %s997_s0  ;;  %v226_v16 = vld [vmem:[#allocation3 + $0x48] sm:$0xff] }
  0x41   :  { %215 = vst.msk [vmem:[#allocation3 + $0x70] sm:$0xff] %vm39_vm0, %v247_v55  ;;  %v225_v17 = vld [vmem:[#allocation3 + $0x40] sm:$0xff]  ;;  %v227_v23 = vld [vmem:[#allocation3 + $0x50] sm:$0xff] }
  0x42   :  { %281 = vrot.lane.b32.xlu0 %v241_v49, %s997_s0  ;;  %v229_v29 = vld [vmem:[#allocation3 + $0x60] sm:$0xff] }
  0x43   :  { %v228_v22 = vld [vmem:[#allocation3 + $0x58] sm:$0xff] }
  0x44   :  { %287 = vrot.lane.b32.xlu1 %v244_v51, %s997_s0 }
  0x45   :  { %v230_v28 = vld [vmem:[#allocation3 + $0x68] sm:$0xff] }
  0x46   :  { %285 = vrot.lane.b32.xlu0 %v243_v50, %s997_s0 }
  0x47   :  { %v232_v34 = vld [vmem:[#allocation3 + $0x78] sm:$0xff] }
  0x48   :  { %291 = vrot.lane.b32.xlu1 %v246_v52, %s997_s0  ;;  %v231_v35 = vld [vmem:[#allocation3 + $0x70] sm:$0xff] }
  0x4a   :  { %289 = vrot.lane.b32.xlu0 %v245_v53, %s997_s0 }
  0x4c   :  { %295 = vrot.lane.b32.xlu1 %v248_v54, %s997_s0 }
  0x4e   :  { %293 = vrot.lane.b32.xlu0 %v247_v55, %s997_s0 }
  0x50   :  { %396 = vrot.lane.b32.xlu1 %v234_v31, %s998_s20 }
  0x52   :  { %394 = vrot.lane.b32.xlu0 %v1085_v30, %s998_s20 }
  0x54   :  { %400 = vrot.lane.b32.xlu1 %v1079_v27, %s998_s20 }
  0x56   :  { %398 = vrot.lane.b32.xlu0 %v1077_v26, %s998_s20 }
  0x58   :  { %404 = vrot.lane.b32.xlu1 %v238_v38, %s998_s20 }
  0x5a   :  { %402 = vrot.lane.b32.xlu0 %v237_v39, %s998_s20 }
  0x5c   :  { %408 = vrot.lane.b32.xlu1 %v240_v44, %s998_s20 }
  0x5e   :  { %406 = vrot.lane.b32.xlu0 %v239_v45, %s998_s20 }
  0x60   :  { %412 = vrot.lane.b32.xlu1 %v242_v48, %s998_s20 }
  0x62   :  { %410 = vrot.lane.b32.xlu0 %v241_v49, %s998_s20 }
  0x64   :  { %416 = vrot.lane.b32.xlu1 %v244_v51, %s998_s20 }
  0x66   :  { %414 = vrot.lane.b32.xlu0 %v243_v50, %s998_s20 }
  0x68   :  { %420 = vrot.lane.b32.xlu1 %v246_v52, %s998_s20 }
  0x6a   :  { %418 = vrot.lane.b32.xlu0 %v245_v53, %s998_s20 }
  0x6c   :  { %424 = vrot.lane.b32.xlu1 %v248_v54, %s998_s20 }
  0x6e   :  { %422 = vrot.lane.b32.xlu0 %v247_v55, %s998_s20 }
  0xa2   :  { %v270_v58 = vpop.permute.xlu1 %269 }
  0xa3   :  { %v315_v59 = vmax.f32 %v219_v56, %v270_v58 }
  0xa4   :  { %v266_v60 = vpop.permute.xlu0 %265 }
  0xa5   :  { %v313_v61 = vmax.f32 %v217_v57, %v266_v60  ;;  %332 = vst.msk [vmem:[#allocation3 + $0x10] sm:$0xff] %vm329_vm2, %v315_v59 }
  0xa6   :  { %v272_v0 = vpop.permute.xlu1 %271 }
  0xa7   :  { %330 = vst.msk [vmem:[#allocation3] sm:$0xff] %vm329_vm2, %v313_v61  ;;  %v316_v1 = vmax.f32 %v220_v62, %v272_v0 }
  0xa8   :  { %v268_v2 = vpop.permute.xlu0 %267 }
  0xa9   :  { %v314_v3 = vmax.f32 %v218_v63, %v268_v2  ;;  %333 = vst.msk [vmem:[#allocation3 + $0x18] sm:$0xff] %vm329_vm2, %v316_v1 }
  0xaa   :  { %v276_v6 = vpop.permute.xlu1 %275 }
  0xab   :  { %331 = vst.msk [vmem:[#allocation3 + $0x8] sm:$0xff] %vm329_vm2, %v314_v3  ;;  %v318_v7 = vmax.f32 %v222_v4, %v276_v6 }
  0xac   :  { %v274_v8 = vpop.permute.xlu0 %273  ;;  %v348_v49 = vld [vmem:[#allocation3 + $0x10] sm:$0xff] }
  0xad   :  { %v317_v9 = vmax.f32 %v221_v5, %v274_v8  ;;  %335 = vst.msk [vmem:[#allocation3 + $0x28] sm:$0xff] %vm329_vm2, %v318_v7 }
  0xae   :  { %v280_v12 = vpop.permute.xlu1 %279  ;;  %v346_v44 = vld [vmem:[#allocation3] sm:$0xff] }
  0xaf   :  { %334 = vst.msk [vmem:[#allocation3 + $0x20] sm:$0xff] %vm329_vm2, %v317_v9  ;;  %v320_v13 = vmax.f32 %v224_v10, %v280_v12 }
  0xb0   :  { %v278_v14 = vpop.permute.xlu0 %277  ;;  %v349_v46 = vld [vmem:[#allocation3 + $0x18] sm:$0xff] }
  0xb1   :  { %v319_v15 = vmax.f32 %v223_v11, %v278_v14  ;;  %337 = vst.msk [vmem:[#allocation3 + $0x38] sm:$0xff] %vm329_vm2, %v320_v13 }
  0xb2   :  { %v284_v18 = vpop.permute.xlu1 %283  ;;  %v347_v41 = vld [vmem:[#allocation3 + $0x8] sm:$0xff] }
  0xb3   :  { %336 = vst.msk [vmem:[#allocation3 + $0x30] sm:$0xff] %vm329_vm2, %v319_v15  ;;  %v322_v19 = vmax.f32 %v226_v16, %v284_v18 }
  0xb4   :  { %v282_v20 = vpop.permute.xlu0 %281  ;;  %v351_v52 = vld [vmem:[#allocation3 + $0x28] sm:$0xff] }
  0xb5   :  { %v321_v21 = vmax.f32 %v225_v17, %v282_v20  ;;  %339 = vst.msk [vmem:[#allocation3 + $0x48] sm:$0xff] %vm329_vm2, %v322_v19 }
  0xb6   :  { %v288_v24 = vpop.permute.xlu1 %287  ;;  %v350_v55 = vld [vmem:[#allocation3 + $0x20] sm:$0xff] }
  0xb7   :  { %338 = vst.msk [vmem:[#allocation3 + $0x40] sm:$0xff] %vm329_vm2, %v321_v21  ;;  %v324_v25 = vmax.f32 %v228_v22, %v288_v24 }
  0xb8   :  { %v286_v26 = vpop.permute.xlu0 %285  ;;  %v353_v60 = vld [vmem:[#allocation3 + $0x38] sm:$0xff] }
  0xb9   :  { %v323_v27 = vmax.f32 %v227_v23, %v286_v26  ;;  %341 = vst.msk [vmem:[#allocation3 + $0x58] sm:$0xff] %vm329_vm2, %v324_v25 }
  0xba   :  { %v292_v30 = vpop.permute.xlu1 %291  ;;  %v352_v63 = vld [vmem:[#allocation3 + $0x30] sm:$0xff] }
  0xbb   :  { %340 = vst.msk [vmem:[#allocation3 + $0x50] sm:$0xff] %vm329_vm2, %v323_v27  ;;  %v326_v31 = vmax.f32 %v230_v28, %v292_v30 }
  0xbc   :  { %v290_v32 = vpop.permute.xlu0 %289  ;;  %v355_v4 = vld [vmem:[#allocation3 + $0x48] sm:$0xff] }
  0xbd   :  { %v325_v33 = vmax.f32 %v229_v29, %v290_v32  ;;  %343 = vst.msk [vmem:[#allocation3 + $0x68] sm:$0xff] %vm329_vm2, %v326_v31 }
  0xbe   :  { %v296_v36 = vpop.permute.xlu1 %295  ;;  %v354_v7 = vld [vmem:[#allocation3 + $0x40] sm:$0xff] }
  0xbf   :  { %342 = vst.msk [vmem:[#allocation3 + $0x60] sm:$0xff] %vm329_vm2, %v325_v33  ;;  %v328_v37 = vmax.f32 %v232_v34, %v296_v36 }
  0xc0   :  { %v294_v38 = vpop.permute.xlu0 %293  ;;  %v357_v17 = vld [vmem:[#allocation3 + $0x58] sm:$0xff] }
  0xc1   :  { %v327_v39 = vmax.f32 %v231_v35, %v294_v38  ;;  %345 = vst.msk [vmem:[#allocation3 + $0x78] sm:$0xff] %vm329_vm2, %v328_v37 }
  0xc2   :  { %v397_v40 = vpop.permute.xlu1 %396  ;;  %v356_v20 = vld [vmem:[#allocation3 + $0x50] sm:$0xff] }
  0xc3   :  { %344 = vst.msk [vmem:[#allocation3 + $0x70] sm:$0xff] %vm329_vm2, %v327_v39  ;;  %v443_v42 = vmax.f32 %v347_v41, %v397_v40 }
  0xc4   :  { %v395_v43 = vpop.permute.xlu0 %394  ;;  %v359_v30 = vld [vmem:[#allocation3 + $0x68] sm:$0xff] }
  0xc5   :  { %v442_v45 = vmax.f32 %v346_v44, %v395_v43  ;;  %460 = vst.msk [vmem:[#allocation3 + $0x8] sm:$0xff] %vm458_vm3, %v443_v42 }
  0xc6   :  { %v401_v47 = vpop.permute.xlu1 %400  ;;  %v358_v33 = vld [vmem:[#allocation3 + $0x60] sm:$0xff] }
  0xc7   :  { %459 = vst.msk [vmem:[#allocation3] sm:$0xff] %vm458_vm3, %v442_v45  ;;  %v445_v48 = vmax.f32 %v349_v46, %v401_v47 }
  0xc8   :  { %v399_v50 = vpop.permute.xlu0 %398  ;;  %v361_v44 = vld [vmem:[#allocation3 + $0x78] sm:$0xff] }
  0xc9   :  { %v444_v51 = vmax.f32 %v348_v49, %v399_v50  ;;  %462 = vst.msk [vmem:[#allocation3 + $0x18] sm:$0xff] %vm458_vm3, %v445_v48 }
  0xca   :  { %v405_v53 = vpop.permute.xlu1 %404  ;;  %v360_v46 = vld [vmem:[#allocation3 + $0x70] sm:$0xff] }
  0xcb   :  { %461 = vst.msk [vmem:[#allocation3 + $0x10] sm:$0xff] %vm458_vm3, %v444_v51  ;;  %v447_v54 = vmax.f32 %v351_v52, %v405_v53 }
  0xcc   :  { %v403_v56 = vpop.permute.xlu0 %402  ;;  %v476_v57 = vld [vmem:[#allocation3 + $0x8] sm:$0xff] }
  0xcd   :  { %v446_v58 = vmax.f32 %v350_v55, %v403_v56  ;;  %492 = vst.msk [vmem:[#allocation2 + $0x8] sm:$0xff] %vm39_vm0, %v476_v57  ;;  %v524_v10 = vld [vmem:[#allocation3 + $0x8] sm:$0x7f] }
  0xce   :  { %v475_v59 = vld [vmem:[#allocation3] sm:$0xff]  ;;  %464 = vst.msk [vmem:[#allocation3 + $0x28] sm:$0xff] %vm458_vm3, %v447_v54  ;;  %v409_v61 = vpop.permute.xlu1 %408  ;;  %v588_v42 = vld [vmem:[#allocation3 + $0x9] sm:$0x7f] }
  0xcf   :  { %491 = vst.msk [vmem:[#allocation2] sm:$0xff] %vm39_vm0, %v475_v59  ;;  %v449_v62 = vmax.f32 %v353_v60, %v409_v61  ;;  %v587_v48 = vld [vmem:[#allocation3 + $0x1] sm:$0xff] }
  0xd0   :  { %463 = vst.msk [vmem:[#allocation3 + $0x20] sm:$0xff] %vm458_vm3, %v446_v58  ;;  %v407_v0 = vpop.permute.xlu0 %406  ;;  %v478_v1 = vld [vmem:[#allocation3 + $0x18] sm:$0xff] }
  0xd1   :  { %v448_v2 = vmax.f32 %v352_v63, %v407_v0  ;;  %494 = vst.msk [vmem:[#allocation2 + $0x18] sm:$0xff] %vm39_vm0, %v478_v1  ;;  %v526_v23 = vld [vmem:[#allocation3 + $0x18] sm:$0x7f] }
  0xd2   :  { %v477_v3 = vld [vmem:[#allocation3 + $0x10] sm:$0xff]  ;;  %466 = vst.msk [vmem:[#allocation3 + $0x38] sm:$0xff] %vm458_vm3, %v449_v62  ;;  %v413_v5 = vpop.permute.xlu1 %412  ;;  %v590_v61 = vld [vmem:[#allocation3 + $0x19] sm:$0x7f] }
  0xd3   :  { %493 = vst.msk [vmem:[#allocation2 + $0x10] sm:$0xff] %vm39_vm0, %v477_v3  ;;  %v451_v6 = vmax.f32 %v355_v4, %v413_v5  ;;  %v589_v0 = vld [vmem:[#allocation3 + $0x11] sm:$0xff] }
  0xd4   :  { %465 = vst.msk [vmem:[#allocation3 + $0x30] sm:$0xff] %vm458_vm3, %v448_v2  ;;  %v411_v8 = vpop.permute.xlu0 %410  ;;  %v508_v9 = vld [vmem:[#allocation2 + $0x9] sm:$0x7f] }
  0xd5   :  { %v480_v11 = vld [vmem:[#allocation3 + $0x28] sm:$0xff]  ;;  %v450_v12 = vmax.f32 %v354_v7, %v411_v8  ;;  %v540_v13 = vmin.f32 %v508_v9, %v524_v10  ;;  %468 = vst.msk [vmem:[#allocation3 + $0x48] sm:$0xff] %vm458_vm3, %v451_v6 }
  0xd6   :  { %v507_v14 = vld [vmem:[#allocation2 + $0x1] sm:$0xff]  ;;  %496 = vst.msk [vmem:[#allocation2 + $0x28] sm:$0xff] %vm39_vm0, %v480_v11  ;;  %v417_v18 = vpop.permute.xlu1 %416  ;;  %v592_v10 = vld [vmem:[#allocation3 + $0x29] sm:$0x7f] }
  0xd7   :  { %v479_v15 = vld [vmem:[#allocation3 + $0x20] sm:$0xff]  ;;  %v539_v16 = vmin.f32 %v507_v14, %v475_v59  ;;  %467 = vst.msk [vmem:[#allocation3 + $0x40] sm:$0xff] %vm458_vm3, %v450_v12  ;;  %v453_v19 = vmax.f32 %v357_v17, %v417_v18  ;;  %v528_v36 = vld [vmem:[#allocation3 + $0x28] sm:$0x7f] }
  0xd8   :  { %495 = vst.msk [vmem:[#allocation2 + $0x20] sm:$0xff] %vm39_vm0, %v479_v15  ;;  %v415_v21 = vpop.permute.xlu0 %414  ;;  %v510_v22 = vld [vmem:[#allocation2 + $0x19] sm:$0x7f] }
  0xd9   :  { %556 = vst.msk [vmem:[#allocation2 + $0x9] sm:$0x7f] %vm105_vm1, %v540_v13  ;;  %v482_v24 = vld [vmem:[#allocation3 + $0x38] sm:$0xff]  ;;  %v452_v25 = vmax.f32 %v356_v20, %v415_v21  ;;  %v542_v26 = vmin.f32 %v510_v22, %v526_v23  ;;  %v591_v13 = vld [vmem:[#allocation3 + $0x21] sm:$0xff] }
  0xda   :  { %555 = vst.msk [vmem:[#allocation2 + $0x1] sm:$0xff] %vm39_vm0, %v539_v16  ;;  %v509_v27 = vld [vmem:[#allocation2 + $0x11] sm:$0xff]  ;;  %498 = vst.msk [vmem:[#allocation2 + $0x38] sm:$0xff] %vm39_vm0, %v482_v24  ;;  %v421_v31 = vpop.permute.xlu1 %420  ;;  %v594_v23 = vld [vmem:[#allocation3 + $0x39] sm:$0x7f] }
  0xdb   :  { %v481_v28 = vld [vmem:[#allocation3 + $0x30] sm:$0xff]  ;;  %470 = vst.msk [vmem:[#allocation3 + $0x58] sm:$0xff] %vm458_vm3, %v453_v19  ;;  %v541_v29 = vmin.f32 %v509_v27, %v477_v3  ;;  %469 = vst.msk [vmem:[#allocation3 + $0x50] sm:$0xff] %vm458_vm3, %v452_v25  ;;  %v455_v32 = vmax.f32 %v359_v30, %v421_v31  ;;  %v530_v54 = vld [vmem:[#allocation3 + $0x38] sm:$0x7f] }
  0xdc   :  { %497 = vst.msk [vmem:[#allocation2 + $0x30] sm:$0xff] %vm39_vm0, %v481_v28  ;;  %v419_v34 = vpop.permute.xlu0 %418  ;;  %v484_v37 = vld [vmem:[#allocation3 + $0x48] sm:$0xff] }
  0xdd   :  { %558 = vst.msk [vmem:[#allocation2 + $0x19] sm:$0x7f] %vm105_vm1, %v542_v26  ;;  %v512_v35 = vld [vmem:[#allocation2 + $0x29] sm:$0x7f]  ;;  %v454_v38 = vmax.f32 %v358_v33, %v419_v34 }
  0xde   :  { %557 = vst.msk [vmem:[#allocation2 + $0x11] sm:$0xff] %vm39_vm0, %v541_v29  ;;  %v544_v39 = vmin.f32 %v512_v35, %v528_v36  ;;  %500 = vst.msk [vmem:[#allocation2 + $0x48] sm:$0xff] %vm39_vm0, %v484_v37  ;;  %v483_v41 = vld [vmem:[#allocation3 + $0x40] sm:$0xff]  ;;  %v425_v45 = vpop.permute.xlu1 %424  ;;  %v532_v4 = vld [vmem:[#allocation3 + $0x48] sm:$0x7f] }
  0xdf   :  { %v511_v40 = vld [vmem:[#allocation2 + $0x21] sm:$0xff]  ;;  %472 = vst.msk [vmem:[#allocation3 + $0x68] sm:$0xff] %vm458_vm3, %v455_v32  ;;  %471 = vst.msk [vmem:[#allocation3 + $0x60] sm:$0xff] %vm458_vm3, %v454_v38  ;;  %v457_v49 = vmax.f32 %v361_v44, %v425_v45  ;;  %v596_v38 = vld [vmem:[#allocation3 + $0x49] sm:$0x7f] }
  0xe0   :  { %v543_v43 = vmin.f32 %v511_v40, %v479_v15  ;;  %499 = vst.msk [vmem:[#allocation2 + $0x40] sm:$0xff] %vm39_vm0, %v483_v41  ;;  %v423_v50 = vpop.permute.xlu0 %422 }
  0xe1   :  { %v571_v47 = vld [vmem:[#allocation2] sm:$0xff]  ;;  %560 = vst.msk [vmem:[#allocation2 + $0x29] sm:$0x7f] %vm105_vm1, %v544_v39  ;;  %v572_v51 = vld [vmem:[#allocation2 + $0x8] sm:$0x7f]  ;;  %v456_v56 = vmax.f32 %v360_v46, %v423_v50 }
  0xe2   :  { %v603_v52 = vmin.f32 %v571_v47, %v587_v48  ;;  %559 = vst.msk [vmem:[#allocation2 + $0x21] sm:$0xff] %vm39_vm0, %v543_v43  ;;  %v514_v53 = vld [vmem:[#allocation2 + $0x39] sm:$0x7f]  ;;  %v604_v57 = vmin.f32 %v572_v51, %v588_v42  ;;  %v485_v60 = vld [vmem:[#allocation3 + $0x50] sm:$0xff] }
  0xe3   :  { %v486_v55 = vld [vmem:[#allocation3 + $0x58] sm:$0xff]  ;;  %v546_v58 = vmin.f32 %v514_v53, %v530_v54  ;;  %474 = vst.msk [vmem:[#allocation3 + $0x78] sm:$0xff] %vm458_vm3, %v457_v49  ;;  %473 = vst.msk [vmem:[#allocation3 + $0x70] sm:$0xff] %vm458_vm3, %v456_v56 }
  0xe4   :  { %v513_v59 = vld [vmem:[#allocation2 + $0x31] sm:$0xff]  ;;  %502 = vst.msk [vmem:[#allocation2 + $0x58] sm:$0xff] %vm39_vm0, %v486_v55  ;;  %619 = vst.msk [vmem:[#allocation2] sm:$0xff] %vm39_vm0, %v603_v52  ;;  %v598_v51 = vld [vmem:[#allocation3 + $0x59] sm:$0x7f] }
  0xe5   :  { %v545_v62 = vmin.f32 %v513_v59, %v481_v28  ;;  %501 = vst.msk [vmem:[#allocation2 + $0x50] sm:$0xff] %vm39_vm0, %v485_v60  ;;  %v573_v63 = vld [vmem:[#allocation2 + $0x10] sm:$0xff]  ;;  %v574_v1 = vld [vmem:[#allocation2 + $0x18] sm:$0x7f]  ;;  %v516_v3 = vld [vmem:[#allocation2 + $0x49] sm:$0x7f] }
  0xe6   :  { %620 = vst.msk [vmem:[#allocation2 + $0x8] sm:$0x7f] %vm105_vm1, %v604_v57  ;;  %562 = vst.msk [vmem:[#allocation2 + $0x39] sm:$0x7f] %vm105_vm1, %v546_v58  ;;  %v605_v2 = vmin.f32 %v573_v63, %v589_v0  ;;  %v488_v5 = vld [vmem:[#allocation3 + $0x68] sm:$0xff]  ;;  %v606_v6 = vmin.f32 %v574_v1, %v590_v61  ;;  %v548_v7 = vmin.f32 %v516_v3, %v532_v4  ;;  %v487_v9 = vld [vmem:[#allocation3 + $0x60] sm:$0xff] }
  0xe7   :  { %561 = vst.msk [vmem:[#allocation2 + $0x31] sm:$0xff] %vm39_vm0, %v545_v62  ;;  %v515_v8 = vld [vmem:[#allocation2 + $0x41] sm:$0xff]  ;;  %504 = vst.msk [vmem:[#allocation2 + $0x68] sm:$0xff] %vm39_vm0, %v488_v5  ;;  %v534_v17 = vld [vmem:[#allocation3 + $0x58] sm:$0x7f] }
  0xe8   :  { %621 = vst.msk [vmem:[#allocation2 + $0x10] sm:$0xff] %vm39_vm0, %v605_v2  ;;  %v547_v11 = vmin.f32 %v515_v8, %v483_v41  ;;  %503 = vst.msk [vmem:[#allocation2 + $0x60] sm:$0xff] %vm39_vm0, %v487_v9  ;;  %v593_v28 = vld [vmem:[#allocation3 + $0x31] sm:$0xff]  ;;  %v536_v32 = vld [vmem:[#allocation3 + $0x68] sm:$0x7f] }
  0xe9   :  { %622 = vst.msk [vmem:[#allocation2 + $0x18] sm:$0x7f] %vm105_vm1, %v606_v6  ;;  %v575_v12 = vld [vmem:[#allocation2 + $0x20] sm:$0xff]  ;;  %564 = vst.msk [vmem:[#allocation2 + $0x49] sm:$0x7f] %vm105_vm1, %v548_v7  ;;  %v597_v54 = vld [vmem:[#allocation3 + $0x51] sm:$0xff] }
  0xea   :  { %v576_v14 = vld [vmem:[#allocation2 + $0x28] sm:$0x7f]  ;;  %v607_v15 = vmin.f32 %v575_v12, %v591_v13  ;;  %563 = vst.msk [vmem:[#allocation2 + $0x41] sm:$0xff] %vm39_vm0, %v547_v11  ;;  %v490_v18 = vld [vmem:[#allocation3 + $0x78] sm:$0xff]  ;;  %v489_v22 = vld [vmem:[#allocation3 + $0x70] sm:$0xff] }
  0xeb   :  { %v518_v16 = vld [vmem:[#allocation2 + $0x59] sm:$0x7f]  ;;  %v608_v19 = vmin.f32 %v576_v14, %v592_v10  ;;  %506 = vst.msk [vmem:[#allocation2 + $0x78] sm:$0xff] %vm39_vm0, %v490_v18  ;;  %505 = vst.msk [vmem:[#allocation2 + $0x70] sm:$0xff] %vm39_vm0, %v489_v22  ;;  %v1213_v26 = vld [vmem:[#allocation2] sm:$0xff] }
  0xec   :  { %v550_v20 = vmin.f32 %v518_v16, %v534_v17  ;;  %v517_v21 = vld [vmem:[#allocation2 + $0x51] sm:$0xff]  ;;  %623 = vst.msk [vmem:[#allocation2 + $0x20] sm:$0xff] %vm39_vm0, %v607_v15  ;;  %715 = vrot.lane.b32.xlu0 %v1213_v26, %s997_s0  ;;  %651 = vst.msk [vmem:[#allocation7] sm:$0xff] %vm39_vm0, %v1213_v26  ;;  %v595_v41 = vld [vmem:[#allocation3 + $0x41] sm:$0xff] }
  0xed   :  { %v549_v24 = vmin.f32 %v517_v21, %v485_v60  ;;  %v1211_v25 = vld [vmem:[#allocation2 + $0x8] sm:$0xff]  ;;  %624 = vst.msk [vmem:[#allocation2 + $0x28] sm:$0x7f] %vm105_vm1, %v608_v19  ;;  %v538_v45 = vld [vmem:[#allocation3 + $0x78] sm:$0x7f] }
  0xee   :  { %v577_v27 = vld [vmem:[#allocation2 + $0x30] sm:$0xff]  ;;  %566 = vst.msk [vmem:[#allocation2 + $0x59] sm:$0x7f] %vm105_vm1, %v550_v20  ;;  %717 = vrot.lane.b32.xlu1 %v1211_v25, %s997_s0  ;;  %v578_v29 = vld [vmem:[#allocation2 + $0x38] sm:$0x7f]  ;;  %v599_v62 = vld [vmem:[#allocation3 + $0x61] sm:$0xff] }
  0xef   :  { %652 = vst.msk [vmem:[#allocation7 + $0x8] sm:$0xff] %vm39_vm0, %v1211_v25  ;;  %v609_v30 = vmin.f32 %v577_v27, %v593_v28  ;;  %565 = vst.msk [vmem:[#allocation2 + $0x51] sm:$0xff] %vm39_vm0, %v549_v24  ;;  %v520_v31 = vld [vmem:[#allocation2 + $0x69] sm:$0x7f]  ;;  %v610_v33 = vmin.f32 %v578_v29, %v594_v23  ;;  %v519_v35 = vld [vmem:[#allocation2 + $0x61] sm:$0xff] }
  0xf0   :  { %v552_v34 = vmin.f32 %v520_v31, %v536_v32  ;;  %v1226_v36 = vld [vmem:[#allocation2 + $0x18] sm:$0xff]  ;;  %v1228_v37 = vld [vmem:[#allocation2 + $0x10] sm:$0xff]  ;;  %v551_v39 = vmin.f32 %v519_v35, %v487_v9  ;;  %v600_v60 = vld [vmem:[#allocation3 + $0x69] sm:$0x7f] }
  0xf1   :  { %625 = vst.msk [vmem:[#allocation2 + $0x30] sm:$0xff] %vm39_vm0, %v609_v30  ;;  %654 = vst.msk [vmem:[#allocation7 + $0x18] sm:$0xff] %vm39_vm0, %v1226_v36  ;;  %v579_v40 = vld [vmem:[#allocation2 + $0x40] sm:$0xff]  ;;  %719 = vrot.lane.b32.xlu0 %v1228_v37, %s997_s0  ;;  %v580_v42 = vld [vmem:[#allocation2 + $0x48] sm:$0x7f] }
  0xf2   :  { %626 = vst.msk [vmem:[#allocation2 + $0x38] sm:$0x7f] %vm105_vm1, %v610_v33  ;;  %568 = vst.msk [vmem:[#allocation2 + $0x69] sm:$0x7f] %vm105_vm1, %v552_v34  ;;  %721 = vrot.lane.b32.xlu1 %v1226_v36, %s997_s0  ;;  %v611_v43 = vmin.f32 %v579_v40, %v595_v41  ;;  %v522_v44 = vld [vmem:[#allocation2 + $0x79] sm:$0x7f]  ;;  %v612_v46 = vmin.f32 %v580_v42, %v596_v38 }
  0xf3   :  { %653 = vst.msk [vmem:[#allocation7 + $0x10] sm:$0xff] %vm39_vm0, %v1228_v37  ;;  %567 = vst.msk [vmem:[#allocation2 + $0x61] sm:$0xff] %vm39_vm0, %v551_v39  ;;  %v554_v47 = vmin.f32 %v522_v44, %v538_v45  ;;  %v521_v48 = vld [vmem:[#allocation2 + $0x71] sm:$0xff]  ;;  %v1244_v50 = vld [vmem:[#allocation2 + $0x20] sm:$0xff] }
  0xf4   :  { %v1242_v49 = vld [vmem:[#allocation2 + $0x28] sm:$0xff]  ;;  %627 = vst.msk [vmem:[#allocation2 + $0x40] sm:$0xff] %vm39_vm0, %v611_v43  ;;  %v553_v52 = vmin.f32 %v521_v48, %v489_v22  ;;  %655 = vst.msk [vmem:[#allocation7 + $0x20] sm:$0xff] %vm39_vm0, %v1244_v50  ;;  %v602_v4 = vld [vmem:[#allocation3 + $0x79] sm:$0x7f] }
  0xf5   :  { %628 = vst.msk [vmem:[#allocation2 + $0x48] sm:$0x7f] %vm105_vm1, %v612_v46  ;;  %570 = vst.msk [vmem:[#allocation2 + $0x79] sm:$0x7f] %vm105_vm1, %v554_v47  ;;  %723 = vrot.lane.b32.xlu0 %v1244_v50, %s997_s0  ;;  %v601_v6 = vld [vmem:[#allocation3 + $0x71] sm:$0xff]  ;;  %v667_v19 = vld [vmem:[#allocation7] sm:$0xff] }
  0xf6   :  { %656 = vst.msk [vmem:[#allocation7 + $0x28] sm:$0xff] %vm39_vm0, %v1242_v49  ;;  %v581_v53 = vld [vmem:[#allocation2 + $0x50] sm:$0xff]  ;;  %725 = vrot.lane.b32.xlu1 %v1242_v49, %s997_s0  ;;  %v582_v55 = vld [vmem:[#allocation2 + $0x58] sm:$0x7f]  ;;  %569 = vst.msk [vmem:[#allocation2 + $0x71] sm:$0xff] %vm39_vm0, %v553_v52 }
  0xf7   :  { %v613_v56 = vmin.f32 %v581_v53, %v597_v54  ;;  %v614_v57 = vmin.f32 %v582_v55, %v598_v51  ;;  %v668_v17 = vld [vmem:[#allocation7 + $0x8] sm:$0xff] }
  0xf8   :  { %v689_v59 = vld [vmem:[#allocation2 + $0x30] sm:$0xff]  ;;  %v670_v22 = vld [vmem:[#allocation7 + $0x18] sm:$0xff] }
  0xf9   :  { %v690_v58 = vld [vmem:[#allocation2 + $0x38] sm:$0xff]  ;;  %629 = vst.msk [vmem:[#allocation2 + $0x50] sm:$0xff] %vm39_vm0, %v613_v56  ;;  %657 = vst.msk [vmem:[#allocation7 + $0x30] sm:$0xff] %vm39_vm0, %v689_v59  ;;  %727 = vrot.lane.b32.xlu0 %v689_v59, %s997_s0 }
  0xfa   :  { %630 = vst.msk [vmem:[#allocation2 + $0x58] sm:$0x7f] %vm105_vm1, %v614_v57  ;;  %v583_v61 = vld [vmem:[#allocation2 + $0x60] sm:$0xff]  ;;  %729 = vrot.lane.b32.xlu1 %v690_v58, %s997_s0  ;;  %v584_v63 = vld [vmem:[#allocation2 + $0x68] sm:$0x7f]  ;;  %v669_v24 = vld [vmem:[#allocation7 + $0x10] sm:$0xff] }
  0xfb   :  { %658 = vst.msk [vmem:[#allocation7 + $0x38] sm:$0xff] %vm39_vm0, %v690_v58  ;;  %v615_v0 = vmin.f32 %v583_v61, %v599_v62  ;;  %v616_v1 = vmin.f32 %v584_v63, %v600_v60  ;;  %v691_v3 = vld [vmem:[#allocation2 + $0x40] sm:$0xff] }
  0xfc   :  { %v692_v2 = vld [vmem:[#allocation2 + $0x48] sm:$0xff]  ;;  %659 = vst.msk [vmem:[#allocation7 + $0x40] sm:$0xff] %vm39_vm0, %v691_v3  ;;  %v671_v30 = vld [vmem:[#allocation7 + $0x20] sm:$0xff] }
  0xfd   :  { %631 = vst.msk [vmem:[#allocation2 + $0x60] sm:$0xff] %vm39_vm0, %v615_v0  ;;  %660 = vst.msk [vmem:[#allocation7 + $0x48] sm:$0xff] %vm39_vm0, %v692_v2  ;;  %v585_v5 = vld [vmem:[#allocation2 + $0x70] sm:$0xff]  ;;  %731 = vrot.lane.b32.xlu0 %v691_v3, %s997_s0  ;;  %v586_v7 = vld [vmem:[#allocation2 + $0x78] sm:$0x7f] }
  0xfe   :  { %632 = vst.msk [vmem:[#allocation2 + $0x68] sm:$0x7f] %vm105_vm1, %v616_v1  ;;  %733 = vrot.lane.b32.xlu1 %v692_v2, %s997_s0  ;;  %v617_v8 = vmin.f32 %v585_v5, %v601_v6  ;;  %v618_v9 = vmin.f32 %v586_v7, %v602_v4  ;;  %v672_v28 = vld [vmem:[#allocation7 + $0x28] sm:$0xff] }
 0x100   :  { %v693_v11 = vld [vmem:[#allocation2 + $0x50] sm:$0xff]  ;;  %633 = vst.msk [vmem:[#allocation2 + $0x70] sm:$0xff] %vm39_vm0, %v617_v8 }
 0x101   :  { %v694_v10 = vld [vmem:[#allocation2 + $0x58] sm:$0xff]  ;;  %634 = vst.msk [vmem:[#allocation2 + $0x78] sm:$0x7f] %vm105_vm1, %v618_v9  ;;  %735 = vrot.lane.b32.xlu0 %v693_v11, %s997_s0 }
 0x102   :  { %662 = vst.msk [vmem:[#allocation7 + $0x58] sm:$0xff] %vm39_vm0, %v694_v10  ;;  %661 = vst.msk [vmem:[#allocation7 + $0x50] sm:$0xff] %vm39_vm0, %v693_v11  ;;  %737 = vrot.lane.b32.xlu1 %v694_v10, %s997_s0  ;;  %v674_v34 = vld [vmem:[#allocation7 + $0x38] sm:$0xff] }
 0x103   :  { %v675_v42 = vld [vmem:[#allocation7 + $0x40] sm:$0xff] }
 0x104   :  { %v695_v13 = vld [vmem:[#allocation2 + $0x60] sm:$0xff]  ;;  %v676_v40 = vld [vmem:[#allocation7 + $0x48] sm:$0xff] }
 0x105   :  { %v696_v12 = vld [vmem:[#allocation2 + $0x68] sm:$0xff]  ;;  %663 = vst.msk [vmem:[#allocation7 + $0x60] sm:$0xff] %vm39_vm0, %v695_v13  ;;  %739 = vrot.lane.b32.xlu0 %v695_v13, %s997_s0 }
 0x106   :  { %664 = vst.msk [vmem:[#allocation7 + $0x68] sm:$0xff] %vm39_vm0, %v696_v12  ;;  %741 = vrot.lane.b32.xlu1 %v696_v12, %s997_s0 }
 0x107   :  { %v697_v15 = vld [vmem:[#allocation2 + $0x70] sm:$0xff] }
 0x108   :  { %v698_v14 = vld [vmem:[#allocation2 + $0x78] sm:$0xff]  ;;  %665 = vst.msk [vmem:[#allocation7 + $0x70] sm:$0xff] %vm39_vm0, %v697_v15 }
 0x109   :  { %666 = vst.msk [vmem:[#allocation7 + $0x78] sm:$0xff] %vm39_vm0, %v698_v14  ;;  %743 = vrot.lane.b32.xlu0 %v697_v15, %s997_s0  ;;  %v678_v46 = vld [vmem:[#allocation7 + $0x58] sm:$0xff]  ;;  %v677_v48 = vld [vmem:[#allocation7 + $0x50] sm:$0xff] }
 0x10a   :  { %745 = vrot.lane.b32.xlu1 %v698_v14, %s997_s0 }
 0x10c   :  { %v679_v54 = vld [vmem:[#allocation7 + $0x60] sm:$0xff] }
 0x10d   :  { %843 = vrot.lane.b32.xlu0 %v1213_v26, %s998_s20  ;;  %v680_v52 = vld [vmem:[#allocation7 + $0x68] sm:$0xff] }
 0x10e   :  { %845 = vrot.lane.b32.xlu1 %v1211_v25, %s998_s20 }
 0x10f   :  { %v681_v60 = vld [vmem:[#allocation7 + $0x70] sm:$0xff] }
 0x111   :  { %847 = vrot.lane.b32.xlu0 %v1228_v37, %s998_s20 }
 0x112   :  { %849 = vrot.lane.b32.xlu1 %v1226_v36, %s998_s20  ;;  %v673_v36 = vld [vmem:[#allocation7 + $0x30] sm:$0xff] }
 0x115   :  { %851 = vrot.lane.b32.xlu0 %v1244_v50, %s998_s20 }
 0x116   :  { %853 = vrot.lane.b32.xlu1 %v1242_v49, %s998_s20 }
 0x119   :  { %855 = vrot.lane.b32.xlu0 %v689_v59, %s998_s20 }
 0x11a   :  { %857 = vrot.lane.b32.xlu1 %v690_v58, %s998_s20  ;;  %v682_v58 = vld [vmem:[#allocation7 + $0x78] sm:$0xff] }
 0x11d   :  { %859 = vrot.lane.b32.xlu0 %v691_v3, %s998_s20 }
 0x11e   :  { %861 = vrot.lane.b32.xlu1 %v692_v2, %s998_s20 }
 0x121   :  { %863 = vrot.lane.b32.xlu0 %v693_v11, %s998_s20 }
 0x122   :  { %865 = vrot.lane.b32.xlu1 %v694_v10, %s998_s20 }
 0x125   :  { %867 = vrot.lane.b32.xlu0 %v695_v13, %s998_s20 }
 0x126   :  { %869 = vrot.lane.b32.xlu1 %v696_v12, %s998_s20 }
 0x129   :  { %871 = vrot.lane.b32.xlu0 %v697_v15, %s998_s20 }
 0x12a   :  { %873 = vrot.lane.b32.xlu1 %v698_v14, %s998_s20 }
 0x15e   :  { %v716_v18 = vpop.permute.xlu0 %715 }
 0x15f   :  { %v763_v21 = vmin.f32 %v667_v19, %v716_v18 }
 0x160   :  { %v718_v16 = vpop.permute.xlu1 %717 }
 0x161   :  { %v764_v20 = vmin.f32 %v668_v17, %v718_v16  ;;  %779 = vst.msk [vmem:[#allocation7] sm:$0xff] %vm329_vm2, %v763_v21 }
 0x163   :  { %780 = vst.msk [vmem:[#allocation7 + $0x8] sm:$0xff] %vm329_vm2, %v764_v20  ;;  %v720_v25 = vpop.permute.xlu0 %719 }
 0x164   :  { %v722_v23 = vpop.permute.xlu1 %721  ;;  %v765_v27 = vmin.f32 %v669_v24, %v720_v25 }
 0x165   :  { %v766_v26 = vmin.f32 %v670_v22, %v722_v23 }
 0x166   :  { %781 = vst.msk [vmem:[#allocation7 + $0x10] sm:$0xff] %vm329_vm2, %v765_v27 }
 0x167   :  { %782 = vst.msk [vmem:[#allocation7 + $0x18] sm:$0xff] %vm329_vm2, %v766_v26  ;;  %v724_v31 = vpop.permute.xlu0 %723 }
 0x168   :  { %v726_v29 = vpop.permute.xlu1 %725  ;;  %v767_v33 = vmin.f32 %v671_v30, %v724_v31  ;;  %v795_v3 = vld [vmem:[#allocation7] sm:$0xff] }
 0x169   :  { %v768_v32 = vmin.f32 %v672_v28, %v726_v29 }
 0x16a   :  { %783 = vst.msk [vmem:[#allocation7 + $0x20] sm:$0xff] %vm329_vm2, %v767_v33  ;;  %v796_v1 = vld [vmem:[#allocation7 + $0x8] sm:$0xff] }
 0x16b   :  { %784 = vst.msk [vmem:[#allocation7 + $0x28] sm:$0xff] %vm329_vm2, %v768_v32  ;;  %v728_v37 = vpop.permute.xlu0 %727 }
 0x16c   :  { %v730_v35 = vpop.permute.xlu1 %729  ;;  %v769_v39 = vmin.f32 %v673_v36, %v728_v37 }
 0x16d   :  { %v770_v38 = vmin.f32 %v674_v34, %v730_v35  ;;  %v797_v8 = vld [vmem:[#allocation7 + $0x10] sm:$0xff] }
 0x16e   :  { %785 = vst.msk [vmem:[#allocation7 + $0x30] sm:$0xff] %vm329_vm2, %v769_v39  ;;  %v798_v6 = vld [vmem:[#allocation7 + $0x18] sm:$0xff] }
 0x16f   :  { %786 = vst.msk [vmem:[#allocation7 + $0x38] sm:$0xff] %vm329_vm2, %v770_v38  ;;  %v732_v43 = vpop.permute.xlu0 %731 }
 0x170   :  { %v734_v41 = vpop.permute.xlu1 %733  ;;  %v771_v45 = vmin.f32 %v675_v42, %v732_v43 }
 0x171   :  { %v772_v44 = vmin.f32 %v676_v40, %v734_v41  ;;  %v799_v14 = vld [vmem:[#allocation7 + $0x20] sm:$0xff] }
 0x172   :  { %787 = vst.msk [vmem:[#allocation7 + $0x40] sm:$0xff] %vm329_vm2, %v771_v45  ;;  %v800_v12 = vld [vmem:[#allocation7 + $0x28] sm:$0xff] }
 0x173   :  { %788 = vst.msk [vmem:[#allocation7 + $0x48] sm:$0xff] %vm329_vm2, %v772_v44  ;;  %v736_v49 = vpop.permute.xlu0 %735 }
 0x174   :  { %v738_v47 = vpop.permute.xlu1 %737  ;;  %v773_v51 = vmin.f32 %v677_v48, %v736_v49 }
 0x175   :  { %v774_v50 = vmin.f32 %v678_v46, %v738_v47  ;;  %v801_v20 = vld [vmem:[#allocation7 + $0x30] sm:$0xff] }
 0x176   :  { %789 = vst.msk [vmem:[#allocation7 + $0x50] sm:$0xff] %vm329_vm2, %v773_v51  ;;  %v802_v18 = vld [vmem:[#allocation7 + $0x38] sm:$0xff] }
 0x177   :  { %790 = vst.msk [vmem:[#allocation7 + $0x58] sm:$0xff] %vm329_vm2, %v774_v50  ;;  %v740_v55 = vpop.permute.xlu0 %739 }
 0x178   :  { %v742_v53 = vpop.permute.xlu1 %741  ;;  %v775_v57 = vmin.f32 %v679_v54, %v740_v55 }
 0x179   :  { %v776_v56 = vmin.f32 %v680_v52, %v742_v53  ;;  %v803_v26 = vld [vmem:[#allocation7 + $0x40] sm:$0xff] }
 0x17a   :  { %791 = vst.msk [vmem:[#allocation7 + $0x60] sm:$0xff] %vm329_vm2, %v775_v57  ;;  %v804_v24 = vld [vmem:[#allocation7 + $0x48] sm:$0xff] }
 0x17b   :  { %792 = vst.msk [vmem:[#allocation7 + $0x68] sm:$0xff] %vm329_vm2, %v776_v56  ;;  %v744_v61 = vpop.permute.xlu0 %743 }
 0x17c   :  { %v746_v59 = vpop.permute.xlu1 %745  ;;  %v777_v63 = vmin.f32 %v681_v60, %v744_v61 }
 0x17d   :  { %v778_v62 = vmin.f32 %v682_v58, %v746_v59  ;;  %v805_v32 = vld [vmem:[#allocation7 + $0x50] sm:$0xff] }
 0x17e   :  { %793 = vst.msk [vmem:[#allocation7 + $0x70] sm:$0xff] %vm329_vm2, %v777_v63  ;;  %v806_v30 = vld [vmem:[#allocation7 + $0x58] sm:$0xff] }
 0x17f   :  { %794 = vst.msk [vmem:[#allocation7 + $0x78] sm:$0xff] %vm329_vm2, %v778_v62  ;;  %v844_v2 = vpop.permute.xlu0 %843 }
 0x180   :  { %v846_v0 = vpop.permute.xlu1 %845  ;;  %v891_v5 = vmin.f32 %v795_v3, %v844_v2 }
 0x181   :  { %v892_v4 = vmin.f32 %v796_v1, %v846_v0  ;;  %v807_v38 = vld [vmem:[#allocation7 + $0x60] sm:$0xff] }
 0x182   :  { %907 = vst.msk [vmem:[#allocation7] sm:$0xff] %vm458_vm3, %v891_v5  ;;  %v808_v36 = vld [vmem:[#allocation7 + $0x68] sm:$0xff] }
 0x183   :  { %908 = vst.msk [vmem:[#allocation7 + $0x8] sm:$0xff] %vm458_vm3, %v892_v4  ;;  %v848_v9 = vpop.permute.xlu0 %847 }
 0x184   :  { %v850_v7 = vpop.permute.xlu1 %849  ;;  %v893_v11 = vmin.f32 %v797_v8, %v848_v9 }
 0x185   :  { %v894_v10 = vmin.f32 %v798_v6, %v850_v7  ;;  %v809_v44 = vld [vmem:[#allocation7 + $0x70] sm:$0xff] }
 0x186   :  { %909 = vst.msk [vmem:[#allocation7 + $0x10] sm:$0xff] %vm458_vm3, %v893_v11  ;;  %v810_v42 = vld [vmem:[#allocation7 + $0x78] sm:$0xff] }
 0x187   :  { %910 = vst.msk [vmem:[#allocation7 + $0x18] sm:$0xff] %vm458_vm3, %v894_v10  ;;  %v852_v15 = vpop.permute.xlu0 %851 }
 0x188   :  { %v854_v13 = vpop.permute.xlu1 %853  ;;  %v895_v17 = vmin.f32 %v799_v14, %v852_v15 }
 0x189   :  { %v896_v16 = vmin.f32 %v800_v12, %v854_v13 }
 0x18a   :  { %911 = vst.msk [vmem:[#allocation7 + $0x20] sm:$0xff] %vm458_vm3, %v895_v17 }
 0x18b   :  { %912 = vst.msk [vmem:[#allocation7 + $0x28] sm:$0xff] %vm458_vm3, %v896_v16  ;;  %v856_v21 = vpop.permute.xlu0 %855 }
 0x18c   :  { %v858_v19 = vpop.permute.xlu1 %857  ;;  %v897_v23 = vmin.f32 %v801_v20, %v856_v21 }
 0x18d   :  { %v898_v22 = vmin.f32 %v802_v18, %v858_v19 }
 0x18e   :  { %913 = vst.msk [vmem:[#allocation7 + $0x30] sm:$0xff] %vm458_vm3, %v897_v23 }
 0x18f   :  { %914 = vst.msk [vmem:[#allocation7 + $0x38] sm:$0xff] %vm458_vm3, %v898_v22  ;;  %v860_v27 = vpop.permute.xlu0 %859 }
 0x190   :  { %v862_v25 = vpop.permute.xlu1 %861  ;;  %v899_v29 = vmin.f32 %v803_v26, %v860_v27 }
 0x191   :  { %v900_v28 = vmin.f32 %v804_v24, %v862_v25 }
 0x192   :  { %915 = vst.msk [vmem:[#allocation7 + $0x40] sm:$0xff] %vm458_vm3, %v899_v29 }
 0x193   :  { %916 = vst.msk [vmem:[#allocation7 + $0x48] sm:$0xff] %vm458_vm3, %v900_v28  ;;  %v864_v33 = vpop.permute.xlu0 %863 }
 0x194   :  { %v866_v31 = vpop.permute.xlu1 %865  ;;  %v901_v35 = vmin.f32 %v805_v32, %v864_v33 }
 0x195   :  { %v902_v34 = vmin.f32 %v806_v30, %v866_v31 }
 0x196   :  { %917 = vst.msk [vmem:[#allocation7 + $0x50] sm:$0xff] %vm458_vm3, %v901_v35 }
 0x197   :  { %918 = vst.msk [vmem:[#allocation7 + $0x58] sm:$0xff] %vm458_vm3, %v902_v34  ;;  %v868_v39 = vpop.permute.xlu0 %867 }
 0x198   :  { %v870_v37 = vpop.permute.xlu1 %869  ;;  %v903_v41 = vmin.f32 %v807_v38, %v868_v39 }
 0x199   :  { %v904_v40 = vmin.f32 %v808_v36, %v870_v37 }
 0x19a   :  { %919 = vst.msk [vmem:[#allocation7 + $0x60] sm:$0xff] %vm458_vm3, %v903_v41 }
 0x19b   :  { %920 = vst.msk [vmem:[#allocation7 + $0x68] sm:$0xff] %vm458_vm3, %v904_v40  ;;  %v872_v45 = vpop.permute.xlu0 %871 }
 0x19c   :  { %v874_v43 = vpop.permute.xlu1 %873  ;;  %v905_v47 = vmin.f32 %v809_v44, %v872_v45 }
 0x19d   :  { %v906_v46 = vmin.f32 %v810_v42, %v874_v43 }
 0x19e   :  { %921 = vst.msk [vmem:[#allocation7 + $0x70] sm:$0xff] %vm458_vm3, %v905_v47 }
 0x19f   :  { %922 = vst.msk [vmem:[#allocation7 + $0x78] sm:$0xff] %vm458_vm3, %v906_v46 }
 0x1a0   :  { %979 = shalt.err (!%p976_p12)
}
 0x1a1   :  { %s980_s26 = scalar_lea.hbm %s1354_s1, 2048 }
 0x1a2   :  { %p981_p13 = scmp.ne.s32.totalorder %s1354_s1, %s980_s26  ;;  %p984_p0 = scmp.lt.u32.totalorder %s980_s26, %s1354_s1 }
 0x1a4   :  { %p986_p1 = pnand %p984_p0, %p981_p13 }
 0x1a6   :  { %989 = shalt.err (!%p986_p1)
}
 0x1a7   :  { %934 = dma.vmem_to_hbm [thread:$0]  %s929_s22, 2048, %s1354_s1, [#allocation6], %s995_s16, %s995_s16, %s996_s17  }
 0x1a8   :  { %992 = dma.done.wait [#allocation6], 2048  }
 0x1a9   :  { %993 = vsyncadd [#allocation6], 4294965248 }
 0x1aa   :  { %938 = vsyncpa [#allocation5], 1 }
 0x1ab   :  { %939 = vsyncpa [#allocation6], 1 }

</bundles_post_ra>
